<compile_context>
chip_gen: v7x
topology: tpu7x:2x2x1
jax: 0.10.0
libtpu: 0.0.40
codegen_flags: <defaults>
</compile_context>

<pallas_src>
import functools
import math

import jax
import jax.numpy as jnp
from jax import lax
from jax.experimental import pallas as pl
from jax.experimental.pallas import tpu as pltpu

POOL = 6                    # MaxPool1d(kernel_size=6, stride=6)
K1, K2, K3 = 12, 8, 6       # conv kernel widths
C_IN, C1, C2, C3 = 8, 128, 128, 64


def _round_up(x, m):
    return (x + m - 1) // m * m


# ------------------------------ fused kernel -------------------------------

def _netcnn_kernel(p1_ref, w1_ref, b1_ref, w2_ref, b2_ref, w3_ref, b3_ref,
                   o_ref, pool_scr):
    """Fused conv1 -> conv2 -> conv3 -> MaxPool1d(6,6) for one batch block.

    p1_ref  : (bb*Lp, 96)   bf16  conv1 im2col patches, per-sample pitch Lp
    w1_ref  : (96, 128)     bf16  conv1 weights, all 12 taps folded
    w2_ref  : (4, 256, 128) bf16  conv2 weights, adjacent taps paired
    w3_ref  : (3, 256, 64)  bf16  conv3 weights, adjacent taps paired
    bX_ref  : (1, C)        f32   biases
    o_ref   : (bb, l4, 64)  f32   pooled output block
    pool_scr: (bb*Lp-24, 64) f32  running 6-row maxima (VMEM scratch)

    Rows >= the per-sample valid length only hold harmless finite garbage
    (zero-padded inputs -> bias values); valid output rows never read them.
    """
    bb, l4, _ = o_ref.shape
    rows = p1_ref.shape[0]
    lp = rows // bb                       # per-sample row pitch (multiple of 8)

    # conv1: single 96-deep matmul over every (sample, position) row.
    y1 = jnp.dot(p1_ref[...], w1_ref[...], preferred_element_type=jnp.float32)
    y1 = y1 + b1_ref[...]                                   # (rows, 128) f32

    def paired_conv(act, w_ref, b_ref, rows_out):
        """sum_j [act[2j:] | act[2j+1:]] @ W_pair[j]  (256-deep contractions)."""
        acc = None
        for j in range(w_ref.shape[0]):
            lhs = jnp.concatenate(
                [act[2 * j: 2 * j + rows_out, :],
                 act[2 * j + 1: 2 * j + 1 + rows_out, :]], axis=-1)
            part = jnp.dot(lhs.astype(jnp.bfloat16), w_ref[j],
                           preferred_element_type=jnp.float32)
            acc = part if acc is None else acc + part
        return acc + b_ref[...]

    rows2 = rows - 8
    rows3 = rows - 16
    rows4 = rows - 24
    y2 = paired_conv(y1, w2_ref, b2_ref, rows2)             # (rows2, 128) f32
    y3 = paired_conv(y2, w3_ref, b3_ref, rows3)             # (rows3,  64) f32

    # MaxPool1d(6,6): running 6-row maximum, then gather the window starts
    # (per-sample pitch `lp`, in-sample stride POOL) via strided scratch reads.
    m6 = y3[:rows4, :]
    for k in range(1, POOL):
        m6 = jnp.maximum(m6, y3[k:k + rows4, :])
    pool_scr[...] = m6
    for t in range(l4):
        o_ref[:, t, :] = pool_scr[pl.ds(POOL * t, bb, stride=lp), :]
    # Dropout(0.3): inference mode -> identity.


# ------------------------------- wrapper ------------------------------------

def netcnn_forward(torch_params, x_ncl, *, batch_block=16):
    """x_ncl: (N, 8, L) PyTorch NCL layout -> (N, 64, L4)."""
    n, c_in, length = x_ncl.shape
    assert c_in == C_IN, f"expected {C_IN} input channels, got {c_in}"
    l1 = length - K1 + 1
    l2 = l1 - K2 + 1
    l3 = l2 - K3 + 1
    l4 = l3 // POOL
    if l4 < 1:
        raise ValueError(
            f"input length {length} too short: need L >= {K1 + K2 + K3 - 3 + POOL}")

    # ---- batch blocking: >=2 grid steps when possible (dual-TC on v7x) ----
    bb = max(1, min(batch_block, n))
    if n > 1 and pl.cdiv(n, bb) < 2:
        bb = pl.cdiv(n, 2)
    nblk = pl.cdiv(n, bb)
    n_pad = nblk * bb

    # Per-sample row pitch: multiple of 8 with >=8 rows of slack so every
    # stage's valid rows (l1/l2/l3 and pooled window starts) stay inside the
    # flat 2-D block layout without any in-kernel reshape.
    lp = _round_up(l1 + 8, 8)
    rows_blk = bb * lp

    # ---- wrapper-side layout plumbing (tiny) ----
    w1 = torch_params['conv1_w']; b1 = torch_params['conv1_b']
    w2 = torch_params['conv2_w']; b2 = torch_params['conv2_b']
    w3 = torch_params['conv3_w']; b3 = torch_params['conv3_b']

    # (Cout, Cin, K) -> (K, Cin, Cout); conv1 flattened, conv2/3 tap-paired.
    w1f = jnp.transpose(w1, (2, 1, 0)).reshape(K1 * C_IN, C1).astype(jnp.bfloat16)
    w2p = jnp.transpose(w2, (2, 1, 0)).reshape(K2 // 2, 2 * C1, C2).astype(jnp.bfloat16)
    w3p = jnp.transpose(w3, (2, 1, 0)).reshape(K3 // 2, 2 * C2, C3).astype(jnp.bfloat16)
    b1r = b1.reshape(1, C1).astype(jnp.float32)
    b2r = b2.reshape(1, C2).astype(jnp.float32)
    b3r = b3.reshape(1, C3).astype(jnp.float32)

    x_nlc = jnp.transpose(x_ncl, (0, 2, 1)).astype(jnp.bfloat16)     # (n, L, 8)
    # conv1 im2col: column k*8+c of row m is x[n, c, m+k] -> 96-deep contraction.
    p1 = jnp.concatenate([x_nlc[:, k:k + l1, :] for k in range(K1)], axis=-1)
    p1 = jnp.pad(p1, ((0, n_pad - n), (0, lp - l1), (0, 0)))
    p1_2d = p1.reshape(n_pad * lp, K1 * C_IN)                        # (n_pad*lp, 96)

    flops = 2 * n * (l1 * (K1 * C_IN) * C1 + l2 * (K2 * C1) * C2 + l3 * (K3 * C2) * C3)
    bytes_accessed = (p1_2d.size * 2 + (w1f.size + w2p.size + w3p.size) * 2
                      + (b1r.size + b2r.size + b3r.size) * 4 + n_pad * l4 * C3 * 4)

    out = pl.pallas_call(
        _netcnn_kernel,
        out_shape=jax.ShapeDtypeStruct((n_pad, l4, C3), jnp.float32),
        grid=(nblk,),
        in_specs=[
            pl.BlockSpec((rows_blk, K1 * C_IN), lambda i: (i, 0)),
            pl.BlockSpec(w1f.shape, lambda i: (0, 0)),
            pl.BlockSpec(b1r.shape, lambda i: (0, 0)),
            pl.BlockSpec(w2p.shape, lambda i: (0, 0, 0)),
            pl.BlockSpec(b2r.shape, lambda i: (0, 0)),
            pl.BlockSpec(w3p.shape, lambda i: (0, 0, 0)),
            pl.BlockSpec(b3r.shape, lambda i: (0, 0)),
        ],
        out_specs=pl.BlockSpec((bb, l4, C3), lambda i: (i, 0, 0)),
        scratch_shapes=[pltpu.VMEM((rows_blk - 24, C3), jnp.float32)],
        compiler_params=pltpu.CompilerParams(
            dimension_semantics=("parallel",),
            vmem_limit_bytes=32 * 1024 * 1024),
        cost_estimate=pl.CostEstimate(flops=flops, transcendentals=0,
                                      bytes_accessed=bytes_accessed),
    )(p1_2d, w1f, b1r, w2p, b2r, w3p, b3r)

    # Drop batch padding, back to PyTorch NCL output layout (N, 64, L4).
    return jnp.transpose(out[:n], (0, 2, 1))


# --------------------------- parameter creation ----------------------------

def init_params(key):
    """PyTorch-layout NetCNN parameters: conv weights (Cout, Cin, K)."""
    specs = [('conv1', C1, C_IN, K1), ('conv2', C2, C1, K2), ('conv3', C3, C2, K3)]
    params = {}
    keys = jax.random.split(key, 2 * len(specs))
    for i, (name, c_out, c_in, k) in enumerate(specs):
        bound = 1.0 / math.sqrt(c_in * k)
        params[name + '_w'] = jax.random.uniform(
            keys[2 * i], (c_out, c_in, k), jnp.float32, -bound, bound)
        params[name + '_b'] = jax.random.uniform(
            keys[2 * i + 1], (c_out,), jnp.float32, -bound, bound)
    return params


# --------------------------- pure-JAX reference -----------------------------

def _ref_conv1d(x_ncl, w, b):
    c_out, _, k = w.shape
    l_out = x_ncl.shape[2] - k + 1
    patches = jnp.stack([x_ncl[:, :, i:i + l_out] for i in range(k)], axis=-1)
    y = jnp.einsum('nclk,ock->nol', patches, w, precision=lax.Precision.HIGHEST)
    return y + b[None, :, None]


def reference_forward(torch_params, x_ncl):
    y = _ref_conv1d(x_ncl, torch_params['conv1_w'], torch_params['conv1_b'])
    y = _ref_conv1d(y, torch_params['conv2_w'], torch_params['conv2_b'])
    y = _ref_conv1d(y, torch_params['conv3_w'], torch_params['conv3_b'])
    n, c, l = y.shape
    l4 = l // POOL
    return jnp.max(y[:, :, :l4 * POOL].reshape(n, c, l4, POOL), axis=-1)


# ----------------------------------- main ------------------------------------

if __name__ == "__main__":
    key = jax.random.PRNGKey(0)
    k_param, k_x = jax.random.split(key)
    params = init_params(k_param)

    N, L = 2, 64            # conv chain: 64 -> 53 -> 46 -> 41; MaxPool(6,6) -> 6
    x = jax.random.normal(k_x, (N, C_IN, L), jnp.float32)

    fwd = jax.jit(functools.partial(netcnn_forward, params))
    out = jax.block_until_ready(fwd(x))
    assert out.shape == (N, C3, 6) and out.dtype == jnp.float32

    ref = reference_forward(params, x)
    max_err = float(jnp.max(jnp.abs(out - ref)))
    assert bool(jnp.allclose(out, ref, atol=5e-2, rtol=5e-2)), (
        "mismatch, max abs diff = %f" % max_err)

    print("KERNEL_OK")
</pallas_src>

<mosaic_0001>
module attributes {stable_mosaic.version = 11 : i64} {
  func.func @_netcnn_kernel(%arg0: i32, %arg1: memref<64x96xbf16, #tpu.memory_space<vmem>>, %arg2: memref<96x128xbf16, #tpu.memory_space<vmem>>, %arg3: memref<1x128xf32, #tpu.memory_space<vmem>>, %arg4: memref<4x256x128xbf16, #tpu.memory_space<vmem>>, %arg5: memref<1x128xf32, #tpu.memory_space<vmem>>, %arg6: memref<3x256x64xbf16, #tpu.memory_space<vmem>>, %arg7: memref<1x64xf32, #tpu.memory_space<vmem>>, %arg8: memref<1x6x64xf32, #tpu.memory_space<vmem>>, %arg9: memref<40x64xf32, #tpu.memory_space<vmem>>) attributes {dimension_semantics = [#tpu.dimension_semantics<parallel>], iteration_bounds = array<i64: 2>, scalar_prefetch = 0 : i64, scratch_operands = 1 : i64, tpu.core_type = #tpu.core_type<tc>, window_params = [{transform_indices = @transform_0, window_bounds = array<i64: 64, 96>}, {pipeline_mode = #tpu.pipeline_mode<synchronous>, transform_indices = @transform_1, window_bounds = array<i64: 96, 128>}, {pipeline_mode = #tpu.pipeline_mode<synchronous>, transform_indices = @transform_2, window_bounds = array<i64: 1, 128>}, {pipeline_mode = #tpu.pipeline_mode<synchronous>, transform_indices = @transform_3, window_bounds = array<i64: 4, 256, 128>}, {pipeline_mode = #tpu.pipeline_mode<synchronous>, transform_indices = @transform_4, window_bounds = array<i64: 1, 128>}, {pipeline_mode = #tpu.pipeline_mode<synchronous>, transform_indices = @transform_5, window_bounds = array<i64: 3, 256, 64>}, {pipeline_mode = #tpu.pipeline_mode<synchronous>, transform_indices = @transform_6, window_bounds = array<i64: 1, 64>}, {transform_indices = @transform_7, window_bounds = array<i64: 1, 6, 64>}]} {
    %c0 = arith.constant 0 : index
    %c0_0 = arith.constant 0 : index
    %0 = vector.load %arg1[%c0, %c0_0] : memref<64x96xbf16, #tpu.memory_space<vmem>>, vector<64x96xbf16>
    %c0_1 = arith.constant 0 : index
    %c0_2 = arith.constant 0 : index
    %1 = vector.load %arg2[%c0_1, %c0_2] : memref<96x128xbf16, #tpu.memory_space<vmem>>, vector<96x128xbf16>
    %cst = arith.constant dense<0.000000e+00> : vector<64x128xf32>
    %2 = tpu.matmul %0, %1, %cst {dimension_numbers = #tpu.dot_dimension_numbers<[1], [0], [0], [1], [0, 0, 1, 1], [], []>} : vector<64x96xbf16>, vector<96x128xbf16>, vector<64x128xf32> -> vector<64x128xf32>
    %c0_3 = arith.constant 0 : index
    %c0_4 = arith.constant 0 : index
    %3 = vector.load %arg3[%c0_3, %c0_4] : memref<1x128xf32, #tpu.memory_space<vmem>>, vector<1x128xf32>
    %4 = vector.broadcast %3 : vector<1x128xf32> to vector<64x128xf32>
    %5 = arith.addf %2, %4 : vector<64x128xf32>
    %6 = vector.extract_strided_slice %5 {offsets = [0, 0], sizes = [56, 128], strides = [1, 1]} : vector<64x128xf32> to vector<56x128xf32>
    %7 = vector.extract_strided_slice %5 {offsets = [1, 0], sizes = [56, 128], strides = [1, 1]} : vector<64x128xf32> to vector<56x128xf32>
    %8 = tpu.concatenate %6, %7 in 1 : vector<56x128xf32>, vector<56x128xf32> -> vector<56x256xf32>
    %9 = arith.truncf %8 : vector<56x256xf32> to vector<56x256xbf16>
    %c0_5 = arith.constant 0 : index
    %c0_6 = arith.constant 0 : index
    %c0_7 = arith.constant 0 : index
    %10 = vector.load %arg4[%c0_5, %c0_6, %c0_7] : memref<4x256x128xbf16, #tpu.memory_space<vmem>>, vector<1x256x128xbf16>
    %11 = vector.shape_cast %10 : vector<1x256x128xbf16> to vector<256x128xbf16>
    %cst_8 = arith.constant dense<0.000000e+00> : vector<56x128xf32>
    %12 = tpu.matmul %9, %11, %cst_8 {dimension_numbers = #tpu.dot_dimension_numbers<[1], [0], [0], [1], [0, 0, 1, 1], [], []>} : vector<56x256xbf16>, vector<256x128xbf16>, vector<56x128xf32> -> vector<56x128xf32>
    %13 = vector.extract_strided_slice %5 {offsets = [2, 0], sizes = [56, 128], strides = [1, 1]} : vector<64x128xf32> to vector<56x128xf32>
    %14 = vector.extract_strided_slice %5 {offsets = [3, 0], sizes = [56, 128], strides = [1, 1]} : vector<64x128xf32> to vector<56x128xf32>
    %15 = tpu.concatenate %13, %14 in 1 : vector<56x128xf32>, vector<56x128xf32> -> vector<56x256xf32>
    %16 = arith.truncf %15 : vector<56x256xf32> to vector<56x256xbf16>
    %c1 = arith.constant 1 : index
    %c0_9 = arith.constant 0 : index
    %c0_10 = arith.constant 0 : index
    %17 = vector.load %arg4[%c1, %c0_9, %c0_10] : memref<4x256x128xbf16, #tpu.memory_space<vmem>>, vector<1x256x128xbf16>
    %18 = vector.shape_cast %17 : vector<1x256x128xbf16> to vector<256x128xbf16>
    %cst_11 = arith.constant dense<0.000000e+00> : vector<56x128xf32>
    %19 = tpu.matmul %16, %18, %cst_11 {dimension_numbers = #tpu.dot_dimension_numbers<[1], [0], [0], [1], [0, 0, 1, 1], [], []>} : vector<56x256xbf16>, vector<256x128xbf16>, vector<56x128xf32> -> vector<56x128xf32>
    %20 = arith.addf %12, %19 : vector<56x128xf32>
    %21 = vector.extract_strided_slice %5 {offsets = [4, 0], sizes = [56, 128], strides = [1, 1]} : vector<64x128xf32> to vector<56x128xf32>
    %22 = vector.extract_strided_slice %5 {offsets = [5, 0], sizes = [56, 128], strides = [1, 1]} : vector<64x128xf32> to vector<56x128xf32>
    %23 = tpu.concatenate %21, %22 in 1 : vector<56x128xf32>, vector<56x128xf32> -> vector<56x256xf32>
    %24 = arith.truncf %23 : vector<56x256xf32> to vector<56x256xbf16>
    %c2 = arith.constant 2 : index
    %c0_12 = arith.constant 0 : index
    %c0_13 = arith.constant 0 : index
    %25 = vector.load %arg4[%c2, %c0_12, %c0_13] : memref<4x256x128xbf16, #tpu.memory_space<vmem>>, vector<1x256x128xbf16>
    %26 = vector.shape_cast %25 : vector<1x256x128xbf16> to vector<256x128xbf16>
    %cst_14 = arith.constant dense<0.000000e+00> : vector<56x128xf32>
    %27 = tpu.matmul %24, %26, %cst_14 {dimension_numbers = #tpu.dot_dimension_numbers<[1], [0], [0], [1], [0, 0, 1, 1], [], []>} : vector<56x256xbf16>, vector<256x128xbf16>, vector<56x128xf32> -> vector<56x128xf32>
    %28 = arith.addf %20, %27 : vector<56x128xf32>
    %29 = vector.extract_strided_slice %5 {offsets = [6, 0], sizes = [56, 128], strides = [1, 1]} : vector<64x128xf32> to vector<56x128xf32>
    %30 = vector.extract_strided_slice %5 {offsets = [7, 0], sizes = [56, 128], strides = [1, 1]} : vector<64x128xf32> to vector<56x128xf32>
    %31 = tpu.concatenate %29, %30 in 1 : vector<56x128xf32>, vector<56x128xf32> -> vector<56x256xf32>
    %32 = arith.truncf %31 : vector<56x256xf32> to vector<56x256xbf16>
    %c3 = arith.constant 3 : index
    %c0_15 = arith.constant 0 : index
    %c0_16 = arith.constant 0 : index
    %33 = vector.load %arg4[%c3, %c0_15, %c0_16] : memref<4x256x128xbf16, #tpu.memory_space<vmem>>, vector<1x256x128xbf16>
    %34 = vector.shape_cast %33 : vector<1x256x128xbf16> to vector<256x128xbf16>
    %cst_17 = arith.constant dense<0.000000e+00> : vector<56x128xf32>
    %35 = tpu.matmul %32, %34, %cst_17 {dimension_numbers = #tpu.dot_dimension_numbers<[1], [0], [0], [1], [0, 0, 1, 1], [], []>} : vector<56x256xbf16>, vector<256x128xbf16>, vector<56x128xf32> -> vector<56x128xf32>
    %36 = arith.addf %28, %35 : vector<56x128xf32>
    %c0_18 = arith.constant 0 : index
    %c0_19 = arith.constant 0 : index
    %37 = vector.load %arg5[%c0_18, %c0_19] : memref<1x128xf32, #tpu.memory_space<vmem>>, vector<1x128xf32>
    %38 = vector.broadcast %37 : vector<1x128xf32> to vector<56x128xf32>
    %39 = arith.addf %36, %38 : vector<56x128xf32>
    %40 = vector.extract_strided_slice %39 {offsets = [0, 0], sizes = [48, 128], strides = [1, 1]} : vector<56x128xf32> to vector<48x128xf32>
    %41 = vector.extract_strided_slice %39 {offsets = [1, 0], sizes = [48, 128], strides = [1, 1]} : vector<56x128xf32> to vector<48x128xf32>
    %42 = tpu.concatenate %40, %41 in 1 : vector<48x128xf32>, vector<48x128xf32> -> vector<48x256xf32>
    %43 = arith.truncf %42 : vector<48x256xf32> to vector<48x256xbf16>
    %c0_20 = arith.constant 0 : index
    %c0_21 = arith.constant 0 : index
    %c0_22 = arith.constant 0 : index
    %44 = vector.load %arg6[%c0_20, %c0_21, %c0_22] : memref<3x256x64xbf16, #tpu.memory_space<vmem>>, vector<1x256x64xbf16>
    %45 = vector.shape_cast %44 : vector<1x256x64xbf16> to vector<256x64xbf16>
    %cst_23 = arith.constant dense<0.000000e+00> : vector<48x64xf32>
    %46 = tpu.matmul %43, %45, %cst_23 {dimension_numbers = #tpu.dot_dimension_numbers<[1], [0], [0], [1], [0, 0, 1, 1], [], []>} : vector<48x256xbf16>, vector<256x64xbf16>, vector<48x64xf32> -> vector<48x64xf32>
    %47 = vector.extract_strided_slice %39 {offsets = [2, 0], sizes = [48, 128], strides = [1, 1]} : vector<56x128xf32> to vector<48x128xf32>
    %48 = vector.extract_strided_slice %39 {offsets = [3, 0], sizes = [48, 128], strides = [1, 1]} : vector<56x128xf32> to vector<48x128xf32>
    %49 = tpu.concatenate %47, %48 in 1 : vector<48x128xf32>, vector<48x128xf32> -> vector<48x256xf32>
    %50 = arith.truncf %49 : vector<48x256xf32> to vector<48x256xbf16>
    %c1_24 = arith.constant 1 : index
    %c0_25 = arith.constant 0 : index
    %c0_26 = arith.constant 0 : index
    %51 = vector.load %arg6[%c1_24, %c0_25, %c0_26] : memref<3x256x64xbf16, #tpu.memory_space<vmem>>, vector<1x256x64xbf16>
    %52 = vector.shape_cast %51 : vector<1x256x64xbf16> to vector<256x64xbf16>
    %cst_27 = arith.constant dense<0.000000e+00> : vector<48x64xf32>
    %53 = tpu.matmul %50, %52, %cst_27 {dimension_numbers = #tpu.dot_dimension_numbers<[1], [0], [0], [1], [0, 0, 1, 1], [], []>} : vector<48x256xbf16>, vector<256x64xbf16>, vector<48x64xf32> -> vector<48x64xf32>
    %54 = arith.addf %46, %53 : vector<48x64xf32>
    %55 = vector.extract_strided_slice %39 {offsets = [4, 0], sizes = [48, 128], strides = [1, 1]} : vector<56x128xf32> to vector<48x128xf32>
    %56 = vector.extract_strided_slice %39 {offsets = [5, 0], sizes = [48, 128], strides = [1, 1]} : vector<56x128xf32> to vector<48x128xf32>
    %57 = tpu.concatenate %55, %56 in 1 : vector<48x128xf32>, vector<48x128xf32> -> vector<48x256xf32>
    %58 = arith.truncf %57 : vector<48x256xf32> to vector<48x256xbf16>
    %c2_28 = arith.constant 2 : index
    %c0_29 = arith.constant 0 : index
    %c0_30 = arith.constant 0 : index
    %59 = vector.load %arg6[%c2_28, %c0_29, %c0_30] : memref<3x256x64xbf16, #tpu.memory_space<vmem>>, vector<1x256x64xbf16>
    %60 = vector.shape_cast %59 : vector<1x256x64xbf16> to vector<256x64xbf16>
    %cst_31 = arith.constant dense<0.000000e+00> : vector<48x64xf32>
    %61 = tpu.matmul %58, %60, %cst_31 {dimension_numbers = #tpu.dot_dimension_numbers<[1], [0], [0], [1], [0, 0, 1, 1], [], []>} : vector<48x256xbf16>, vector<256x64xbf16>, vector<48x64xf32> -> vector<48x64xf32>
    %62 = arith.addf %54, %61 : vector<48x64xf32>
    %c0_32 = arith.constant 0 : index
    %c0_33 = arith.constant 0 : index
    %63 = vector.load %arg7[%c0_32, %c0_33] : memref<1x64xf32, #tpu.memory_space<vmem>>, vector<1x64xf32>
    %64 = vector.broadcast %63 : vector<1x64xf32> to vector<48x64xf32>
    %65 = arith.addf %62, %64 : vector<48x64xf32>
    %66 = vector.extract_strided_slice %65 {offsets = [0, 0], sizes = [40, 64], strides = [1, 1]} : vector<48x64xf32> to vector<40x64xf32>
    %67 = vector.extract_strided_slice %65 {offsets = [1, 0], sizes = [40, 64], strides = [1, 1]} : vector<48x64xf32> to vector<40x64xf32>
    %68 = arith.maximumf %66, %67 : vector<40x64xf32>
    %69 = vector.extract_strided_slice %65 {offsets = [2, 0], sizes = [40, 64], strides = [1, 1]} : vector<48x64xf32> to vector<40x64xf32>
    %70 = arith.maximumf %68, %69 : vector<40x64xf32>
    %71 = vector.extract_strided_slice %65 {offsets = [3, 0], sizes = [40, 64], strides = [1, 1]} : vector<48x64xf32> to vector<40x64xf32>
    %72 = arith.maximumf %70, %71 : vector<40x64xf32>
    %73 = vector.extract_strided_slice %65 {offsets = [4, 0], sizes = [40, 64], strides = [1, 1]} : vector<48x64xf32> to vector<40x64xf32>
    %74 = arith.maximumf %72, %73 : vector<40x64xf32>
    %75 = vector.extract_strided_slice %65 {offsets = [5, 0], sizes = [40, 64], strides = [1, 1]} : vector<48x64xf32> to vector<40x64xf32>
    %76 = arith.maximumf %74, %75 : vector<40x64xf32>
    %c0_34 = arith.constant 0 : index
    %c0_35 = arith.constant 0 : index
    %77 = vector.load %arg9[%c0_34, %c0_35] : memref<40x64xf32, #tpu.memory_space<vmem>>, vector<40x64xf32>
    tpu.vector_store %arg9[%c0_34, %c0_35], %76 {strides = array<i32>} : memref<40x64xf32, #tpu.memory_space<vmem>>, vector<40x64xf32>,
    %c0_36 = arith.constant 0 : index
    %c0_37 = arith.constant 0 : index
    %78 = tpu.strided_load %arg9[%c0_36, %c0_37] {strides = array<i32: 64, 1>} : memref<40x64xf32, #tpu.memory_space<vmem>>, vector<1x64xf32>
    %c0_38 = arith.constant 0 : index
    %c0_39 = arith.constant 0 : index
    %c0_40 = arith.constant 0 : index
    %79 = vector.load %arg8[%c0_38, %c0_39, %c0_40] : memref<1x6x64xf32, #tpu.memory_space<vmem>>, vector<1x1x64xf32>
    %80 = vector.shape_cast %79 : vector<1x1x64xf32> to vector<1x64xf32>
    %81 = vector.shape_cast %78 : vector<1x64xf32> to vector<1x1x64xf32>
    tpu.vector_store %arg8[%c0_38, %c0_39, %c0_40], %81 {strides = array<i32>} : memref<1x6x64xf32, #tpu.memory_space<vmem>>, vector<1x1x64xf32>,
    %c6 = arith.constant 6 : index
    %c0_41 = arith.constant 0 : index
    %82 = tpu.strided_load %arg9[%c6, %c0_41] {strides = array<i32: 64, 1>} : memref<40x64xf32, #tpu.memory_space<vmem>>, vector<1x64xf32>
    %c0_42 = arith.constant 0 : index
    %c1_43 = arith.constant 1 : index
    %c0_44 = arith.constant 0 : index
    %83 = vector.load %arg8[%c0_42, %c1_43, %c0_44] : memref<1x6x64xf32, #tpu.memory_space<vmem>>, vector<1x1x64xf32>
    %84 = vector.shape_cast %83 : vector<1x1x64xf32> to vector<1x64xf32>
    %85 = vector.shape_cast %82 : vector<1x64xf32> to vector<1x1x64xf32>
    tpu.vector_store %arg8[%c0_42, %c1_43, %c0_44], %85 {strides = array<i32>} : memref<1x6x64xf32, #tpu.memory_space<vmem>>, vector<1x1x64xf32>,
    %c12 = arith.constant 12 : index
    %c0_45 = arith.constant 0 : index
    %86 = tpu.strided_load %arg9[%c12, %c0_45] {strides = array<i32: 64, 1>} : memref<40x64xf32, #tpu.memory_space<vmem>>, vector<1x64xf32>
    %c0_46 = arith.constant 0 : index
    %c2_47 = arith.constant 2 : index
    %c0_48 = arith.constant 0 : index
    %87 = vector.load %arg8[%c0_46, %c2_47, %c0_48] : memref<1x6x64xf32, #tpu.memory_space<vmem>>, vector<1x1x64xf32>
    %88 = vector.shape_cast %87 : vector<1x1x64xf32> to vector<1x64xf32>
    %89 = vector.shape_cast %86 : vector<1x64xf32> to vector<1x1x64xf32>
    tpu.vector_store %arg8[%c0_46, %c2_47, %c0_48], %89 {strides = array<i32>} : memref<1x6x64xf32, #tpu.memory_space<vmem>>, vector<1x1x64xf32>,
    %c18 = arith.constant 18 : index
    %c0_49 = arith.constant 0 : index
    %90 = tpu.strided_load %arg9[%c18, %c0_49] {strides = array<i32: 64, 1>} : memref<40x64xf32, #tpu.memory_space<vmem>>, vector<1x64xf32>
    %c0_50 = arith.constant 0 : index
    %c3_51 = arith.constant 3 : index
    %c0_52 = arith.constant 0 : index
    %91 = vector.load %arg8[%c0_50, %c3_51, %c0_52] : memref<1x6x64xf32, #tpu.memory_space<vmem>>, vector<1x1x64xf32>
    %92 = vector.shape_cast %91 : vector<1x1x64xf32> to vector<1x64xf32>
    %93 = vector.shape_cast %90 : vector<1x64xf32> to vector<1x1x64xf32>
    tpu.vector_store %arg8[%c0_50, %c3_51, %c0_52], %93 {strides = array<i32>} : memref<1x6x64xf32, #tpu.memory_space<vmem>>, vector<1x1x64xf32>,
    %c24 = arith.constant 24 : index
    %c0_53 = arith.constant 0 : index
    %94 = tpu.strided_load %arg9[%c24, %c0_53] {strides = array<i32: 64, 1>} : memref<40x64xf32, #tpu.memory_space<vmem>>, vector<1x64xf32>
    %c0_54 = arith.constant 0 : index
    %c4 = arith.constant 4 : index
    %c0_55 = arith.constant 0 : index
    %95 = vector.load %arg8[%c0_54, %c4, %c0_55] : memref<1x6x64xf32, #tpu.memory_space<vmem>>, vector<1x1x64xf32>
    %96 = vector.shape_cast %95 : vector<1x1x64xf32> to vector<1x64xf32>
    %97 = vector.shape_cast %94 : vector<1x64xf32> to vector<1x1x64xf32>
    tpu.vector_store %arg8[%c0_54, %c4, %c0_55], %97 {strides = array<i32>} : memref<1x6x64xf32, #tpu.memory_space<vmem>>, vector<1x1x64xf32>,
    %c30 = arith.constant 30 : index
    %c0_56 = arith.constant 0 : index
    %98 = tpu.strided_load %arg9[%c30, %c0_56] {strides = array<i32: 64, 1>} : memref<40x64xf32, #tpu.memory_space<vmem>>, vector<1x64xf32>
    %c0_57 = arith.constant 0 : index
    %c5 = arith.constant 5 : index
    %c0_58 = arith.constant 0 : index
    %99 = vector.load %arg8[%c0_57, %c5, %c0_58] : memref<1x6x64xf32, #tpu.memory_space<vmem>>, vector<1x1x64xf32>
    %100 = vector.shape_cast %99 : vector<1x1x64xf32> to vector<1x64xf32>
    %101 = vector.shape_cast %98 : vector<1x64xf32> to vector<1x1x64xf32>
    tpu.vector_store %arg8[%c0_57, %c5, %c0_58], %101 {strides = array<i32>} : memref<1x6x64xf32, #tpu.memory_space<vmem>>, vector<1x1x64xf32>,
    return
  }
  func.func @transform_0(%arg0: i32) -> (i32, i32) {
    %c0_i32 = arith.constant 0 : i32
    %c0_i32_0 = arith.constant 0 : i32
    return %arg0, %c0_i32 : i32, i32
  }
  func.func @transform_1(%arg0: i32) -> (i32, i32) {
    %c0_i32 = arith.constant 0 : i32
    %c0_i32_0 = arith.constant 0 : i32
    %c0_i32_1 = arith.constant 0 : i32
    return %c0_i32, %c0_i32_0 : i32, i32
  }
  func.func @transform_2(%arg0: i32) -> (i32, i32) {
    %c0_i32 = arith.constant 0 : i32
    %c0_i32_0 = arith.constant 0 : i32
    %c0_i32_1 = arith.constant 0 : i32
    return %c0_i32, %c0_i32_0 : i32, i32
  }
  func.func @transform_3(%arg0: i32) -> (i32, i32, i32) {
    %c0_i32 = arith.constant 0 : i32
    %c0_i32_0 = arith.constant 0 : i32
    %c0_i32_1 = arith.constant 0 : i32
    %c0_i32_2 = arith.constant 0 : i32
    return %c0_i32, %c0_i32_0, %c0_i32_1 : i32, i32, i32
  }
  func.func @transform_4(%arg0: i32) -> (i32, i32) {
    %c0_i32 = arith.constant 0 : i32
    %c0_i32_0 = arith.constant 0 : i32
    %c0_i32_1 = arith.constant 0 : i32
    return %c0_i32, %c0_i32_0 : i32, i32
  }
  func.func @transform_5(%arg0: i32) -> (i32, i32, i32) {
    %c0_i32 = arith.constant 0 : i32
    %c0_i32_0 = arith.constant 0 : i32
    %c0_i32_1 = arith.constant 0 : i32
    %c0_i32_2 = arith.constant 0 : i32
    return %c0_i32, %c0_i32_0, %c0_i32_1 : i32, i32, i32
  }
  func.func @transform_6(%arg0: i32) -> (i32, i32) {
    %c0_i32 = arith.constant 0 : i32
    %c0_i32_0 = arith.constant 0 : i32
    %c0_i32_1 = arith.constant 0 : i32
    return %c0_i32, %c0_i32_0 : i32, i32
  }
  func.func @transform_7(%arg0: i32) -> (i32, i32, i32) {
    %c0_i32 = arith.constant 0 : i32
    %c0_i32_0 = arith.constant 0 : i32
    %c0_i32_1 = arith.constant 0 : i32
    return %arg0, %c0_i32, %c0_i32_0 : i32, i32, i32
  }
}

</mosaic_0001>

<bundles_post_ra>
// kernel: netcnn_forward.1
= control target key start
LH: loop header
LB: loop body
LE: loop exit
PB: predicated region body
PF: predicated region fallthrough
CT: control target
= control target key end

     0   :  { %12 = vsyncpa [#allocation4], 0  ;;  %s3577_s0 = inlined_call_operand.vmem [shape: bf16[128,96], index: 0, kind: input, shape index: {}]   ;;  %s3578_s1 = inlined_call_operand.hbm [shape: bf16[96,128], index: 1, kind: input, shape index: {}]   ;;  %s3579_s2 = inlined_call_operand.vmem [shape: f32[1,128], index: 2, kind: input, shape index: {}]   ;;  %s3580_s3 = inlined_call_operand.vmem [shape: bf16[4,256,128], index: 3, kind: input, shape index: {}]   ;;  %s3581_s4 = inlined_call_operand.vmem [shape: f32[1,128], index: 4, kind: input, shape index: {}]   ;;  %s3582_s5 = inlined_call_operand.hbm [shape: bf16[3,256,64], index: 5, kind: input, shape index: {}]   ;;  %s3583_s6 = inlined_call_operand.vmem [shape: f32[1,64], index: 6, kind: input, shape index: {}]   ;;  %s3584_s7 = inlined_call_operand.vmem [shape: f32[2,6,64], index: 7, kind: output, shape index: {}]  }
   0x1   :  { %13 = vsyncpa [#allocation6], 0  ;;  %s3062_s24 = smov 0  }
   0x2 LB: > { %s3068_s25 = sadd.s32 4294967295, %s3016_s24   ;;  %p2264_p0 = scmp.ge.s32.totalorder %s3016_s24, 1  ;;  %s3016_s24 = sphi %s3062_s24, %s19_s24  }
   0x3   : > { %p202_p1 = scmp.lt.s32.totalorder %s3016_s24, 3  ;;  %s3018_s26 = smov [#allocation3]  }
   0x4   : > { %s214_s27 = sshll.u32 %s3018_s26, 4  ;;  %p3585_p3 = scmp.eq.s32.totalorder %s3068_s25, 0  ;;  %s215_s27 = int_to_ptr.vmem [resolvable:$true] %s214_s27 }
   0x5   : > { %p3072_p2 = pnand %p2264_p0, %p202_p1  ;;  %s3019_s29 = smov [#allocation5]  }
   0x6   : > { %s236_s30 = sshll.u32 %s3019_s29, 4  ;;  %s2946_s11 = scalar_lea.hbm %s3578_s1, 768  ;;  %s3085_s30 = int_to_ptr.vmem [resolvable:$true] %s236_s30 }
   0x7   : > { %s3587_s28 = scalar_select %p3072_p2, 1, 0 }
   0x8   : > { %p2801_p4 = pneg %p3072_p2  ;;  %p2947_p6 = scmp.ne.s32.totalorder %s3578_s1, %s2946_s11 }
   0x9   : > { %p2953_p10 = scmp.lt.u32.totalorder %s2946_s11, %s3578_s1 }
   0xa   : > { %p3081_p5 = pnand %p3585_p3, %p2801_p4 }
   0xc   : > { %p2948_p7 = pneg %p3081_p5 }
   0xe   : > { %p2949_p8 = pnand %p2948_p7, %p2947_p6 }
  0x10   : > { %p2950_p9 = pneg %p2949_p8 }
  0x12   : > { %p2955_p11 = pnand %p2953_p10, %p2950_p9 }
  0x14   : > { %2958 = shalt.err (!%p2955_p11)
}
  0x15   : > { %s2959_s16 = scalar_lea.vmem %s215_s27, 768  ;;  %p2967_p1 = scmp.lt.s32.totalorder %s215_s27, %s215_s27 }
  0x16   : > { %p2960_p12 = scmp.ne.s32.totalorder %s215_s27, %s2959_s16  ;;  %p2968_p4 = scmp.lt.s32.totalorder %s2959_s16, %s2959_s16 }
  0x18   : > { %p2962_p13 = pnand %p2960_p12, %p2948_p7  ;;  %p2969_p3 = por %p2968_p4, %p2967_p1 }
  0x1a   : > { %p2963_p0 = pneg %p2962_p13 }
  0x1c   : > { %p2970_p2 = pnand %p2969_p3, %p2963_p0 }
  0x1e   : > { %2973 = shalt.err (!%p2970_p2)
}
  0x1f   : > { %s3020_s17 = smov 64   ;;  %s3021_s18 = smov 4  }
  0x20   : > { %2804 = dma.hbm_to_vmem [thread:$0]  (!%p3081_p5), %s3578_s1, 768, %s215_s27, [#allocation4], %s3020_s17, %s3020_s17, %s3021_s18  }
  0x21   : > { %s2974_s23 = scalar_lea.hbm %s3582_s5, 6144 }
  0x22   : > { %p2975_p6 = scmp.ne.s32.totalorder %s3582_s5, %s2974_s23  ;;  %p2981_p8 = scmp.lt.u32.totalorder %s2974_s23, %s3582_s5 }
  0x24   : > { %p2977_p2 = pnand %p2975_p6, %p2948_p7 }
  0x26   : > { %p2978_p3 = pneg %p2977_p2 }
  0x28   : > { %p2983_p9 = pnand %p2981_p8, %p2978_p3 }
  0x2a   : > { %2986 = shalt.err (!%p2983_p9)
}
  0x2b   : > { %s2987_s27 = scalar_lea.vmem %s3085_s30, 6144  ;;  %p2995_p13 = scmp.lt.s32.totalorder %s3085_s30, %s3085_s30 }
  0x2c   : > { %p2988_p10 = scmp.ne.s32.totalorder %s3085_s30, %s2987_s27  ;;  %p2996_p0 = scmp.lt.s32.totalorder %s2987_s27, %s2987_s27 }
  0x2e   : > { %p2990_p11 = pnand %p2988_p10, %p2948_p7  ;;  %p2997_p1 = por %p2996_p0, %p2995_p13 }
  0x30   : > { %p2991_p12 = pneg %p2990_p11 }
  0x32   : > { %p2998_p4 = pnand %p2997_p1, %p2991_p12 }
  0x34   : > { %3001 = shalt.err (!%p2998_p4)
}
  0x35   : > { %2807 = dma.hbm_to_vmem [thread:$0]  (!%p3081_p5), %s3582_s5, 6144, %s3085_s30, [#allocation6], %s3020_s17, %s3020_s17, %s3021_s18  }
  0x36   : > { %p3589_p6 = scmp.ne.s32.totalorder %s3587_s28, 0 }
  0x37   : > { %p3590_p2 = scmp.eq.s32.totalorder (!%p3589_p6), %s3068_s25, 0 }
  0x38   : > { %264 = sbr.rel (%p3589_p6) target bundleno = 895 (0x37f), region = 48 }
  0x3f   : > { %3007 = dma.done.wait (%p3590_p2), [#allocation4], 768   ;;  %p3591_p7 = pmov %p3590_p2 }
  0x40   : > { %p3592_p3 = pmov %p3590_p2 }
  0x41   : > { %3009 = vsyncadd (%p3591_p7), [#allocation4], 4294966528 }
  0x42   : > { %3011 = dma.done.wait (%p3592_p3), [#allocation6], 6144   ;;  %p3593_p8 = pmov %p3590_p2 }
  0x43   : > { %s2271_s8 = sshll.u32 %s3068_s25, 3  ;;  %v2824_v0 = vld [vmem:[#allocation3] sm:$0xff]   ;;  %v2825_v1 = vld [vmem:[#allocation3 + $0x8] sm:$0xff]   ;;  %v2826_v2 = vld [vmem:[#allocation3 + $0x10] sm:$0xff]   ;;  %vm393_vm0 = vcmask 785408   ;;  %vm479_vm1 = vcmask 1046528  }
  0x44   : > { %3013 = vsyncadd (%p3593_p8), [#allocation6], 4294961152  ;;  %p300_p9 = scmp.lt.s32.totalorder %s2271_s8, 15  ;;  %2773 = vmatprep.subr.bf16.mxu0 %v2824_v0  ;;  %v2827_v4 = vld [vmem:[#allocation3 + $0x18] sm:$0xff]   ;;  %v2828_v5 = vld [vmem:[#allocation3 + $0x20] sm:$0xff]   ;;  %vm1185_vm2 = vcmask 1044480  }
  0x45   : > { %2774 = vmatpush3.bf16.msra.mxu0 %v2824_v0  ;;  %v2838_v6 = vld [vmem:[%s3580_s3 + $0xc0] sm:$0xff]   ;;  %v2829_v7 = vld [vmem:[#allocation3 + $0x28] sm:$0xff]   ;;  %v2842_v9 = vld [vmem:[%s3580_s3 + $0xc8] sm:$0xff]   ;;  %vm962_vm3 = vcmask 1045504   ;;  %vm2119_vm4 = vcmask 1043456   ;;  %vm2141_vm5 = vcmask 1042432  }
  0x46   : > { %s3595_s8 = smov (!%p300_p9, %s2271_s8), 15  ;;  %2775 = vmatprep.subr.bf16.mxu0 %v2825_v1  ;;  %2511 = vmatprep.subr.bf16.mxu1 %v2838_v6  ;;  %v2840_v8 = vld [vmem:[%s3580_s3 + $0x80] sm:$0xff]   ;;  %v2844_v12 = vld [vmem:[%s3580_s3 + $0x88] sm:$0xff]   ;;  %v2846_v15 = vld [vmem:[%s3580_s3 + $0xd0] sm:$0xff]   ;;  %vm2163_vm6 = vcmask 523264   ;;  %p305_p5 = scmp.lt.s32.totalorder %s3068_s25, 1 }
  0x47   : > { %s2272_s30 = sshll.u32 %s3595_s8, 2  ;;  %2512 = vmatpush3.bf16.msra.mxu1 %v2840_v8  ;;  %v2834_v10 = vld [vmem:[%s3580_s3 + $0x40] sm:$0xff]   ;;  %v2836_v16 = vld [vmem:[%s3580_s3 + $0x48] sm:$0xff]   ;;  %v2848_v17 = vld [vmem:[%s3580_s3 + $0x90] sm:$0xff]   ;;  %vm2170_vm7 = vcmask 516096  }
  0x48   : > { %s3148_s14 = scalar_lea.vmem %s3577_s0, %s2272_s30  ;;  %2513 = vmatprep.subr.bf16.mxu1 %v2842_v9  ;;  %v2835_v14 = vld [vmem:[%s3580_s3] sm:$0xff]   ;;  %v2837_v18 = vld [vmem:[%s3580_s3 + $0x8] sm:$0xff]   ;;  %v2839_v19 = vld [vmem:[%s3580_s3 + $0x50] sm:$0xff]   ;;  %s3597_s25 = smov (!%p305_p5, %s3068_s25), 1 }
  0x49   : > { %v2830_v3 = vld [vmem:[%s3148_s14] sm:$0xff]   ;;  %2776 = vmatpush3.bf16.msra.mxu0 %v2825_v1  ;;  %v2831_v11 = vld [vmem:[%s3148_s14 + $0x8] sm:$0xff]   ;;  %v2832_v13 = vld [vmem:[%s3148_s14 + $0x10] sm:$0xff]   ;;  %s2273_s26 = sshll.u32 %s3597_s25, 3 }
  0x4a   : > { %2777 = vmatprep.subr.bf16.mxu0 %v2826_v2  ;;  %2785 = vmatprep.mubr.msk.bf16.mxu0 %vm393_vm0, %v2830_v3  ;;  %v2833_v20 = vld [vmem:[%s3148_s14 + $0x18] sm:$0xff]   ;;  %v2841_v21 = vld [vmem:[%s3580_s3 + $0x10] sm:$0xff]   ;;  %v2847_v24 = vld [vmem:[%s3580_s3 + $0x60] sm:$0xff]   ;;  %s308_s9 = scalar_lea.vmem %s3584_s7, %s2273_s26 }
  0x4b   : > { %2514 = vmatpush3.bf16.msra.mxu1 %v2844_v12  ;;  %v2843_v22 = vld [vmem:[%s3580_s3 + $0x58] sm:$0xff]   ;;  %v2849_v25 = vld [vmem:[%s3580_s3 + $0x20] sm:$0xff]   ;;  %v2851_v26 = vld [vmem:[%s3580_s3 + $0x68] sm:$0xff]  }
  0x4c   : > { %2515 = vmatprep.subr.bf16.mxu1 %v2846_v15  ;;  %v2845_v23 = vld [vmem:[%s3580_s3 + $0x18] sm:$0xff]   ;;  %v2853_v28 = vld [vmem:[%s3580_s3 + $0x28] sm:$0xff]   ;;  %v2855_v30 = vld [vmem:[%s3580_s3 + $0x70] sm:$0xff]  }
  0x4d   : > { %2778 = vmatpush3.bf16.msra.mxu0 %v2826_v2  ;;  %v2850_v27 = vld [vmem:[%s3580_s3 + $0xd8] sm:$0xff]   ;;  %v2854_v31 = vld [vmem:[%s3580_s3 + $0xe0] sm:$0xff]   ;;  %v2857_v32 = vld [vmem:[%s3580_s3 + $0x30] sm:$0xff]  }
  0x4e   : > { %2779 = vmatprep.subr.bf16.mxu0 %v2827_v4  ;;  %v2852_v29 = vld [vmem:[%s3580_s3 + $0x98] sm:$0xff]   ;;  %v2856_v33 = vld [vmem:[%s3580_s3 + $0xa0] sm:$0xff]   ;;  %v2858_v35 = vld [vmem:[%s3580_s3 + $0xe8] sm:$0xff]  }
  0x4f   : > { %2516 = vmatpush3.bf16.msra.mxu1 %v2848_v17  ;;  %v2859_v34 = vld [vmem:[%s3580_s3 + $0x78] sm:$0xff]   ;;  %v2860_v37 = vld [vmem:[%s3580_s3 + $0xa8] sm:$0xff]   ;;  %v2863_v38 = vld [vmem:[%s3580_s3 + $0x1c0] sm:$0xff]  }
  0x50   : > { %2517 = vmatprep.subr.bf16.mxu1 %v2850_v27  ;;  %v2861_v36 = vld [vmem:[%s3580_s3 + $0x38] sm:$0xff]   ;;  %v2862_v39 = vld [vmem:[%s3580_s3 + $0xf0] sm:$0xff]   ;;  %v2870_v43 = vld [vmem:[%s3580_s3 + $0x140] sm:$0xff]  }
  0x51   : > { %2780 = vmatpush3.bf16.msra.mxu0 %v2827_v4  ;;  %v2864_v40 = vld [vmem:[%s3580_s3 + $0xb0] sm:$0xff]   ;;  %v2866_v41 = vld [vmem:[%s3580_s3 + $0xf8] sm:$0xff]   ;;  %v2274_v44 = vld [vmem:[%s3579_s2] ss:$0 sm:$0xff] }
  0x52   : > { %2781 = vmatprep.subr.bf16.mxu0 %v2828_v5  ;;  %v2868_v42 = vld [vmem:[%s3580_s3 + $0xb8] sm:$0xff]   ;;  %v2865_v6 = vld [vmem:[%s3580_s3 + $0x180] sm:$0xff]   ;;  %v2871_v27 = vld [vmem:[%s3580_s3 + $0x1d0] sm:$0xff]  }
  0x53   : > { %2518 = vmatpush3.bf16.msra.mxu1 %v2852_v29 }
  0x54   : > { %2519 = vmatprep.subr.bf16.mxu1 %v2854_v31 }
  0x55   : > { %2782 = vmatpush3.bf16.msra.mxu0 %v2828_v5 }
  0x56   : > { %2783 = vmatprep.subr.bf16.mxu0 %v2829_v7 }
  0x57   : > { %2520 = vmatpush3.bf16.msra.mxu1 %v2856_v33 }
  0x58   : > { %2521 = vmatprep.subr.bf16.mxu1 %v2858_v35 }
  0x59   : > { %2784 = vmatpush3.bf16.msra.mxu0 %v2829_v7 }
  0x5a   : > { %2551 = vmatprep.subr.bf16.mxu0 %v2834_v10 }
  0x5b   : > { %2522 = vmatpush3.bf16.msra.mxu1 %v2860_v37 }
  0x5c   : > { %2786 = vmatmul.mubr.msk.bf16.vlgmr.msra.gmra.mrb[0].mxu0 %vm393_vm0, %v2831_v11  ;;  %2523 = vmatprep.subr.bf16.mxu1 %v2862_v39  ;;  %v2867_v11 = vld [vmem:[%s3580_s3 + $0x1c8] sm:$0xff]  }
  0x5d   : > { %2789 = vmatprep.mubr.msk.bf16.mxu0 %vm393_vm0, %v2832_v13  ;;  %2552 = vmatpush3.bf16.msra.mxu0 %v2835_v14 }
  0x5e   : > { %2553 = vmatprep.subr.bf16.mxu0 %v2836_v16 }
  0x5f   : > { %2524 = vmatpush3.bf16.msra.mxu1 %v2864_v40 }
  0x60   : > { %2525 = vmatprep.subr.bf16.mxu1 %v2866_v41  ;;  %v2872_v41 = vld [vmem:[%s3580_s3 + $0x100] sm:$0xff]  }
  0x61   : > { %2554 = vmatpush3.bf16.msra.mxu0 %v2837_v18 }
  0x62   : > { %2555 = vmatprep.subr.bf16.mxu0 %v2839_v19 }
  0x63   : > { %2526 = vmatpush3.bf16.msra.mxu1 %v2868_v42  ;;  %v2873_v42 = vld [vmem:[%s3580_s3 + $0x190] sm:$0xff]  }
  0x64   : > { %2790 = vmatmul.mubr.msk.bf16.gmra.mrb[4].mxu0 %vm393_vm0, %v2833_v20  ;;  %2591 = vmatprep.subr.bf16.mxu1 %v2870_v43 }
  0x65   : > { %2556 = vmatpush3.bf16.msra.mxu0 %v2841_v21  ;;  %v2869_v21 = vld [vmem:[%s3580_s3 + $0x188] sm:$0xff]  }
  0x66   : > { %2557 = vmatprep.subr.bf16.mxu0 %v2843_v22 }
  0x69   : > { %2558 = vmatpush3.bf16.msra.mxu0 %v2845_v23 }
  0x6a   : > { %2559 = vmatprep.subr.bf16.mxu0 %v2847_v24 }
  0x6d   : > { %2560 = vmatpush3.bf16.msra.mxu0 %v2849_v25 }
  0x6e   : > { %2561 = vmatprep.subr.bf16.mxu0 %v2851_v26 }
  0x71   : > { %2562 = vmatpush3.bf16.msra.mxu0 %v2853_v28 }
  0x72   : > { %2563 = vmatprep.subr.bf16.mxu0 %v2855_v30 }
  0x75   : > { %2564 = vmatpush3.bf16.msra.mxu0 %v2857_v32 }
  0x76   : > { %2565 = vmatprep.subr.bf16.mxu0 %v2859_v34 }
  0x79   : > { %2566 = vmatpush3.bf16.msra.mxu0 %v2861_v36 }
  0x7a   : > { %2631 = vmatprep.subr.bf16.mxu0 %v2863_v38 }
 0x12f   : > { %v2787_v45 = vpop.f32.mrb[0].mxu0 }
 0x130   : > { %v449_v46 = vadd.f32 %v2787_v45, %v2274_v44  ;;  %v440_v47 = vpop.f32.mrb[1].mxu0 }
 0x131   : > { %v441_v48 = vadd.f32 %v2274_v44, %v440_v47  ;;  %v2788_v49 = vpop.f32.mrb[2].mxu0 }
 0x132   : > { %v452_v50 = vadd.f32 %v2788_v49, %v2274_v44  ;;  %v443_v51 = vpop.f32.mrb[3].mxu0  ;;  %v483_v53 = vrot.slane %v449_v46, 1  ;;  %v2874_v49 = vld [vmem:[%s3580_s3 + $0x148] sm:$0xff]  }
 0x133   : > { %v444_v52 = vadd.f32 %v2274_v44, %v443_v51  ;;  %v480_v56 = vrot.slane %v441_v48, 1 }
 0x134   : > { %v485_v54 = vrot.slane %v452_v50, 1  ;;  %v3263_v55 = vpack.c.bf16 %v452_v50, %v449_v46 }
 0x135   : > { %v481_v57 = vrot.slane %v444_v52, 1  ;;  %v502_v58 = vpack.c.bf16 %v444_v52, %v441_v48  ;;  %v2875_v52 = vld [vmem:[%s3580_s3 + $0x1d8] sm:$0xff]  }
 0x136   : > { %v486_v59 = vsel %vm479_vm1, %v483_v53, %v485_v54  ;;  %v588_v60 = vrot.slane %v3263_v55, 1  ;;  %v1187_v61 = vrot.slane %v3263_v55, 3  ;;  %v964_v8 = vrot.slane %v3263_v55, 2 }
 0x137   : > { %v482_v62 = vsel %vm479_vm1, %v480_v56, %v481_v57  ;;  %v484_v63 = vsel %vm479_vm1, %v481_v57, %v483_v53  ;;  %v2791_v0 = vpop.f32.mrb[4].mxu0  ;;  %v587_v1 = vrot.slane %v502_v58, 1  ;;  %v1186_v2 = vrot.slane %v502_v58, 3 }
 0x138   : > { %v3270_v3 = vadd.f32 %v2791_v0, %v2274_v44  ;;  %v456_v4 = vpop.f32.mrb[5].mxu0  ;;  %v503_v5 = vpack.c.bf16 %v484_v63, %v482_v62  ;;  %v963_v7 = vrot.slane %v502_v58, 2  ;;  %v2876_v63 = vld [vmem:[%s3580_s3 + $0x108] sm:$0xff]   ;;  %v2877_v0 = vld [vmem:[%s3580_s3 + $0x198] sm:$0xff]  }
 0x139   : > { %v457_v9 = vadd.f32 %v2274_v44, %v456_v4  ;;  %v2792_v10 = vpop.f32.mrb[6].mxu0  ;;  %v589_v12 = vsel %vm479_vm1, %v587_v1, %v588_v60  ;;  %v3283_v13 = vsel %vm1185_vm2, %v1186_v2, %v1187_v61 }
 0x13a   : > { %v468_v14 = vadd.f32 %v2792_v10, %v2274_v44  ;;  %v459_v15 = vpop.f32.mrb[7].mxu0  ;;  %897 = vmatprep.mubr.bf16.mxu0 %v503_v5  ;;  %v491_v16 = vrot.slane %v3270_v3, 1  ;;  %v590_v22 = vrot.slane %v503_v5, 1  ;;  %v3295_v23 = vsel %vm962_vm3, %v963_v7, %v964_v8 }
 0x13b   : > { %v487_v17 = vrot.slane %v457_v9, 1  ;;  %v460_v18 = vadd.f32 %v2274_v44, %v459_v15  ;;  %898 = vmatmul.mubr.bf16.vlgmr.msra.gmra.mrb[8].mxu0 %v502_v58  ;;  %v1189_v28 = vrot.slane %v503_v5, 3  ;;  %v966_v32 = vrot.slane %v503_v5, 2  ;;  %v2882_v15 = vld [vmem:[%s3580_s3 + $0x158] sm:$0xff]  }
 0x13c   : > { %v493_v19 = vrot.slane %v468_v14, 1  ;;  %v3287_v20 = vpack.c.bf16 %v468_v14, %v3270_v3  ;;  %2632 = vmatpush3.bf16.msra.mxu0 %v2865_v6  ;;  %v2878_v6 = vld [vmem:[%s3580_s3 + $0x150] sm:$0xff]  }
 0x13d   : > { %v488_v24 = vsel %vm479_vm1, %v485_v54, %v487_v17  ;;  %v489_v25 = vrot.slane %v460_v18, 1  ;;  %v3298_v26 = vpack.c.bf16 %v460_v18, %v457_v9  ;;  %2633 = vmatprep.subr.bf16.mxu0 %v2867_v11  ;;  %v2885_v18 = vld [vmem:[%s3580_s3 + $0x1a8] sm:$0xff]  }
 0x13e   : > { %v3304_v29 = vsel %vm479_vm1, %v491_v16, %v493_v19  ;;  %v505_v30 = vpack.c.bf16 %v488_v24, %v486_v59  ;;  %v597_v31 = vrot.slane %v3287_v20, 1  ;;  %v1196_v40 = vrot.slane %v3287_v20, 3  ;;  %v2888_v24 = vld [vmem:[%s3580_s3 + $0x120] sm:$0xff]  }
 0x13f   : > { %v3308_v33 = vpack.c.bf16 %v493_v19, %v3304_v29  ;;  %v490_v34 = vsel %vm479_vm1, %v487_v17, %v489_v25  ;;  %v492_v35 = vsel %vm479_vm1, %v489_v25, %v491_v16  ;;  %v593_v36 = vrot.slane %v3298_v26, 1  ;;  %v2883_v16 = vld [vmem:[%s3580_s3 + $0x1e8] sm:$0xff]   ;;  %v2884_v17 = vld [vmem:[%s3580_s3 + $0x118] sm:$0xff]   ;;  %v2886_v19 = vld [vmem:[%s3580_s3 + $0x160] sm:$0xff]  }
 0x140   : > { %905 = vmatprep.mubr.bf16.mxu0 %v505_v30  ;;  %2634 = vmatpush3.bf16.msra.mxu0 %v2869_v21  ;;  %v591_v37 = vrot.slane %v505_v30, 1  ;;  %v507_v38 = vpack.c.bf16 %v492_v35, %v490_v34  ;;  %v1190_v39 = vrot.slane %v505_v30, 3  ;;  %v967_v46 = vrot.slane %v505_v30, 2  ;;  %v2887_v21 = vld [vmem:[%s3580_s3 + $0x1f0] sm:$0xff]   ;;  %v2897_v34 = vld [vmem:[%s3580_s3 + $0x138] sm:$0xff]   ;;  %v2901_v35 = vld [vmem:[#allocation5 + $0x8] sm:$0xff]  }
 0x141   : > { %2635 = vmatprep.subr.bf16.mxu0 %v2871_v27  ;;  %v594_v43 = vsel %vm479_vm1, %v588_v60, %v593_v36  ;;  %v599_v44 = vrot.slane %v3308_v33, 1  ;;  %v3325_v45 = vsel %vm479_vm1, %v593_v36, %v597_v31  ;;  %v1192_v54 = vrot.slane %v3298_v26, 3  ;;  %v2889_v25 = vld [vmem:[%s3580_s3 + $0x1b0] sm:$0xff]   ;;  %v2891_v27 = vld [vmem:[%s3580_s3 + $0x1f8] sm:$0xff]   ;;  %v2902_v36 = vld [vmem:[#allocation5 + $0x50] sm:$0xff]  }
 0x142   : > { %v592_v47 = vsel %vm479_vm1, %v590_v22, %v591_v37  ;;  %v595_v48 = vrot.slane %v507_v38, 1  ;;  %v3332_v50 = vsel %vm1185_vm2, %v1189_v28, %v1190_v39  ;;  %v1194_v51 = vrot.slane %v507_v38, 3  ;;  %v2893_v28 = vld [vmem:[%s3580_s3 + $0x1b8] sm:$0xff]   ;;  %v2895_v30 = vld [vmem:[%s3580_s3 + $0x130] sm:$0xff]  }
 0x143   : > { %737 = vmatprep.mubr.bf16.mxu1 %v592_v47  ;;  %906 = vmatmul.mubr.bf16.gmra.mrb[12].mxu0 %v3263_v55  ;;  %v3339_v53 = vsel %vm962_vm3, %v966_v32, %v967_v46  ;;  %v1198_v56 = vrot.slane %v3308_v33, 3  ;;  %v971_v57 = vrot.slane %v507_v38, 2  ;;  %v969_v62 = vrot.slane %v3298_v26, 2  ;;  %v2880_v55 = vld [vmem:[%s3580_s3 + $0x110] sm:$0xff]   ;;  %v2896_v32 = vld [vmem:[%s3580_s3 + $0x178] sm:$0xff]   ;;  %v2915_v47 = vld [vmem:[#allocation5 + $0x28] sm:$0xff]  }
 0x144   : > { %738 = vmatmul.mubr.bf16.vlgmr.msra.gmra.mrb[0].mxu1 %v589_v12  ;;  %913 = vmatprep.mubr.bf16.mxu0 %v507_v38  ;;  %v596_v58 = vsel %vm479_vm1, %v591_v37, %v595_v48  ;;  %v600_v59 = vsel %vm479_vm1, %v595_v48, %v599_v44  ;;  %v3348_v60 = vsel %vm1185_vm2, %v1190_v39, %v1194_v51  ;;  %v975_v5 = vrot.slane %v3308_v33, 2  ;;  %v2903_v37 = vld [vmem:[#allocation5 + $0x10] sm:$0xff]   ;;  %v2904_v38 = vld [vmem:[#allocation5 + $0xc0] sm:$0xff]   ;;  %v2906_v33 = vld [vmem:[#allocation5 + $0x58] sm:$0xff]  }
 0x145   : > { %2592 = vmatpush3.bf16.msra.mxu1 %v2872_v41  ;;  %2636 = vmatpush3.bf16.msra.mxu0 %v2873_v42  ;;  %v3360_v1 = vsel %vm1185_vm2, %v1187_v61, %v1192_v54  ;;  %v3365_v2 = vsel %vm1185_vm2, %v1194_v51, %v1198_v56  ;;  %v3368_v4 = vsel %vm962_vm3, %v967_v46, %v971_v57  ;;  %v2879_v61 = vld [vmem:[%s3580_s3 + $0x1e0] sm:$0xff]   ;;  %v973_v10 = vrot.slane %v3287_v20, 2  ;;  %v2905_v39 = vld [vmem:[#allocation5 + $0x80] sm:$0xff]   ;;  %v2916_v48 = vld [vmem:[#allocation5 + $0xd8] sm:$0xff]  }
 0x146   : > { %745 = vmatprep.mubr.bf16.mxu1 %v596_v58  ;;  %2593 = vmatprep.subr.bf16.mxu1 %v2874_v49  ;;  %v3380_v7 = vsel %vm1185_vm2, %v1192_v54, %v1196_v40  ;;  %v3385_v9 = vsel %vm962_vm3, %v964_v8, %v969_v62  ;;  %v976_v11 = vsel %vm962_vm3, %v971_v57, %v975_v5  ;;  %v2881_v8 = vld [vmem:[%s3580_s3 + $0x1a0] sm:$0xff]   ;;  %v2910_v42 = vld [vmem:[#allocation5 + $0x60] sm:$0xff]   ;;  %v2917_v49 = vld [vmem:[#allocation5 + $0x98] sm:$0xff]  }
 0x147   : > { %2637 = vmatprep.subr.bf16.mxu0 %v2875_v52  ;;  %v3394_v12 = vsel %vm962_vm3, %v969_v62, %v973_v10  ;;  %v509_v14 = vpack.c.bf16 %v3304_v29, %v3304_v29  ;;  %v508_v22 = vpack.c.bf16 %v3270_v3, %v3270_v3  ;;  %v2892_v3 = vld [vmem:[%s3580_s3 + $0x128] sm:$0xff]   ;;  %v2894_v29 = vld [vmem:[%s3580_s3 + $0x170] sm:$0xff]   ;;  %v2908_v20 = vld [vmem:[#allocation5 + $0xc8] sm:$0xff]  }
 0x148   : > { %v2909_v41 = vld [vmem:[#allocation5 + $0x88] sm:$0xff]   ;;  %v2919_v51 = vld [vmem:[#allocation5 + $0x30] sm:$0xff]   ;;  %v2920_v52 = vld [vmem:[#allocation5 + $0xe0] sm:$0xff]  }
 0x149   : > { %2594 = vmatpush3.bf16.msra.mxu1 %v2876_v63  ;;  %2638 = vmatpush3.bf16.msra.mxu0 %v2877_v0  ;;  %v2914_v46 = vld [vmem:[#allocation5 + $0x68] sm:$0xff]   ;;  %v2922_v54 = vld [vmem:[#allocation5 + $0x78] sm:$0xff]   ;;  %v2930_v0 = vld [vmem:[#allocation5 + $0x140] sm:$0xff]  }
 0x14a   : > { %2595 = vmatprep.subr.bf16.mxu1 %v2878_v6  ;;  %2639 = vmatprep.subr.bf16.mxu0 %v2879_v61  ;;  %v2924_v57 = vld [vmem:[#allocation5 + $0xe8] sm:$0xff]   ;;  %v2928_v62 = vld [vmem:[#allocation5 + $0xf8] sm:$0xff]  }
 0x14b   : > { %914 = vmatmul.mubr.bf16.gmra.mrb[16].mxu0 %v3298_v26  ;;  %v2890_v26 = vld [vmem:[%s3580_s3 + $0x168] sm:$0xff]   ;;  %v2925_v58 = vld [vmem:[#allocation5 + $0xa8] sm:$0xff]   ;;  %v2929_v63 = vld [vmem:[#allocation5 + $0xb8] sm:$0xff]  }
 0x14c   : > { %746 = vmatmul.mubr.bf16.gmra.mrb[4].mxu1 %v594_v43  ;;  %921 = vmatprep.mubr.bf16.mxu0 %v509_v14  ;;  %v2911_v43 = vld [vmem:[#allocation5 + $0x20] sm:$0xff]  }
 0x14d   : > { %2596 = vmatpush3.bf16.msra.mxu1 %v2880_v55  ;;  %2640 = vmatpush3.bf16.msra.mxu0 %v2881_v8 }
 0x14e   : > { %753 = vmatprep.mubr.bf16.mxu1 %v600_v59  ;;  %2597 = vmatprep.subr.bf16.mxu1 %v2882_v15  ;;  %v2926_v59 = vld [vmem:[#allocation5 + $0xf0] sm:$0xff]  }
 0x14f   : > { %2641 = vmatprep.subr.bf16.mxu0 %v2883_v16 }
 0x151   : > { %2598 = vmatpush3.bf16.msra.mxu1 %v2884_v17  ;;  %2642 = vmatpush3.bf16.msra.mxu0 %v2885_v18 }
 0x152   : > { %2599 = vmatprep.subr.bf16.mxu1 %v2886_v19  ;;  %2643 = vmatprep.subr.bf16.mxu0 %v2887_v21 }
 0x153   : > { %922 = vmatmul.mubr.bf16.gmra.mrb[20].mxu0 %v508_v22 }
 0x154   : > { %754 = vmatmul.mubr.bf16.gmra.mrb[8].mxu1 %v3325_v45  ;;  %1336 = vmatprep.mubr.bf16.mxu0 %v3332_v50  ;;  %v2913_v45 = vld [vmem:[#allocation5 + $0x90] sm:$0xff]  }
 0x155   : > { %2600 = vmatpush3.bf16.msra.mxu1 %v2888_v24  ;;  %2644 = vmatpush3.bf16.msra.mxu0 %v2889_v25  ;;  %v2918_v50 = vld [vmem:[#allocation5 + $0x70] sm:$0xff]  }
 0x156   : > { %761 = vmatprep.mubr.bf16.mxu1 %v599_v44  ;;  %2601 = vmatprep.subr.bf16.mxu1 %v2890_v26  ;;  %v2912_v44 = vld [vmem:[#allocation5 + $0xd0] sm:$0xff]  }
 0x157   : > { %2645 = vmatprep.subr.bf16.mxu0 %v2891_v27 }
 0x159   : > { %2602 = vmatpush3.bf16.msra.mxu1 %v2892_v3  ;;  %2646 = vmatpush3.bf16.msra.mxu0 %v2893_v28 }
 0x15a   : > { %2603 = vmatprep.subr.bf16.mxu1 %v2894_v29 }
 0x15c   : > { %1337 = vmatmul.mubr.bf16.vlgmr.msra.gmra.mrb[24].mxu0 %v3283_v13  ;;  %762 = vmatmul.mubr.bf16.gmra.mrb[12].mxu1 %v597_v31  ;;  %v2898_v13 = vld [vmem:[#allocation5 + $0x40] sm:$0xff]   ;;  %v2900_v31 = vld [vmem:[#allocation5 + $0x48] sm:$0xff]  }
 0x15d   : > { %2604 = vmatpush3.bf16.msra.mxu1 %v2895_v30  ;;  %1344 = vmatprep.mubr.bf16.mxu0 %v3348_v60  ;;  %v2927_v60 = vld [vmem:[#allocation5 + $0xb0] sm:$0xff]  }
 0x15e   : > { %1113 = vmatprep.mubr.bf16.mxu1 %v3339_v53  ;;  %2605 = vmatprep.subr.bf16.mxu1 %v2896_v32  ;;  %v2921_v53 = vld [vmem:[#allocation5 + $0xa0] sm:$0xff]  }
 0x15f   : > { %2705 = vmatprep.subr.bf16.mxu0 %v2898_v13 }
 0x161   : > { %2606 = vmatpush3.bf16.msra.mxu1 %v2897_v34 }
 0x162   : > { %2671 = vmatprep.subr.bf16.mxu1 %v2904_v38 }
 0x164   : > { %1345 = vmatmul.mubr.bf16.gmra.mrb[28].mxu0 %v3360_v1  ;;  %1114 = vmatmul.mubr.bf16.vlgmr.msra.gmra.mrb[16].mxu1 %v3295_v23  ;;  %v2899_v23 = vld [vmem:[#allocation5] sm:$0xff]  }
 0x165   : > { %1352 = vmatprep.mubr.bf16.mxu0 %v3365_v2  ;;  %1121 = vmatprep.mubr.bf16.mxu1 %v3368_v4 }
 0x166   : > { %2706 = vmatpush3.bf16.msra.mxu0 %v2899_v23  ;;  %2672 = vmatpush3.bf16.msra.mxu1 %v2905_v39 }
 0x167   : > { %2707 = vmatprep.subr.bf16.mxu0 %v2900_v31  ;;  %2673 = vmatprep.subr.bf16.mxu1 %v2908_v20 }
 0x16a   : > { %2708 = vmatpush3.bf16.msra.mxu0 %v2901_v35  ;;  %2674 = vmatpush3.bf16.msra.mxu1 %v2909_v41 }
 0x16b   : > { %2709 = vmatprep.subr.bf16.mxu0 %v2902_v36  ;;  %2675 = vmatprep.subr.bf16.mxu1 %v2912_v44 }
 0x16c   : > { %1353 = vmatmul.mubr.bf16.gmra.mrb[32].mxu0 %v3380_v7  ;;  %1122 = vmatmul.mubr.bf16.gmra.mrb[20].mxu1 %v3385_v9 }
 0x16d   : > { %1360 = vmatprep.mubr.bf16.mxu0 %v1198_v56  ;;  %1129 = vmatprep.mubr.bf16.mxu1 %v976_v11  ;;  %v2923_v56 = vld [vmem:[#allocation5 + $0x38] sm:$0xff]  }
 0x16e   : > { %2710 = vmatpush3.bf16.msra.mxu0 %v2903_v37  ;;  %2676 = vmatpush3.bf16.msra.mxu1 %v2913_v45 }
 0x16f   : > { %2711 = vmatprep.subr.bf16.mxu0 %v2906_v33  ;;  %2677 = vmatprep.subr.bf16.mxu1 %v2916_v48 }
 0x172   : > { %2678 = vmatpush3.bf16.msra.mxu1 %v2917_v49 }
 0x173   : > { %2679 = vmatprep.subr.bf16.mxu1 %v2920_v52 }
 0x174   : > { %1361 = vmatmul.mubr.bf16.gmra.mrb[36].mxu0 %v1196_v40  ;;  %1130 = vmatmul.mubr.bf16.gmra.mrb[24].mxu1 %v3394_v12  ;;  %v2907_v40 = vld [vmem:[#allocation5 + $0x18] sm:$0xff]  }
 0x175   : > { %1137 = vmatprep.mubr.bf16.mxu1 %v975_v5  ;;  %2712 = vmatpush3.bf16.msra.mxu0 %v2907_v40 }
 0x176   : > { %2713 = vmatprep.subr.bf16.mxu0 %v2910_v42  ;;  %2680 = vmatpush3.bf16.msra.mxu1 %v2921_v53 }
 0x177   : > { %2681 = vmatprep.subr.bf16.mxu1 %v2924_v57 }
 0x179   : > { %2714 = vmatpush3.bf16.msra.mxu0 %v2911_v43 }
 0x17a   : > { %2715 = vmatprep.subr.bf16.mxu0 %v2914_v46  ;;  %2682 = vmatpush3.bf16.msra.mxu1 %v2925_v58 }
 0x17b   : > { %2683 = vmatprep.subr.bf16.mxu1 %v2926_v59 }
 0x17c   : > { %1138 = vmatmul.mubr.bf16.gmra.mrb[28].mxu1 %v973_v10 }
 0x17d   : > { %2716 = vmatpush3.bf16.msra.mxu0 %v2915_v47 }
 0x17e   : > { %2717 = vmatprep.subr.bf16.mxu0 %v2918_v50  ;;  %2684 = vmatpush3.bf16.msra.mxu1 %v2927_v60 }
 0x17f   : > { %2685 = vmatprep.subr.bf16.mxu1 %v2928_v62 }
 0x181   : > { %2718 = vmatpush3.bf16.msra.mxu0 %v2919_v51 }
 0x182   : > { %2719 = vmatprep.subr.bf16.mxu0 %v2922_v54  ;;  %2686 = vmatpush3.bf16.msra.mxu1 %v2929_v63 }
 0x183   : > { %2739 = vmatprep.subr.bf16.mxu1 %v2930_v0 }
 0x185   : > { %2720 = vmatpush3.bf16.msra.mxu0 %v2923_v56 }
 0x20e   : > { %v2567_v1 = vpop.f32.mrb[8].mxu0 }
 0x20f   : > { %v2568_v2 = vpop.f32.mrb[9].mxu0 }
 0x210   : > { %v2569_v4 = vadd.f32 %v2568_v2, %v2567_v1  ;;  %v2570_v5 = vpop.f32.mrb[10].mxu0 }
 0x211   : > { %v2571_v6 = vpop.f32.mrb[11].mxu0 }
 0x212   : > { %v2572_v61 = vadd.f32 %v2571_v6, %v2570_v5 }
 0x216   : > { %v2573_v7 = vpop.f32.mrb[12].mxu0 }
 0x217   : > { %v2527_v9 = vpop.f32.mrb[0].mxu1  ;;  %v2574_v10 = vpop.f32.mrb[13].mxu0 }
 0x218   : > { %v2575_v11 = vadd.f32 %v2574_v10, %v2573_v7  ;;  %v2528_v12 = vpop.f32.mrb[1].mxu1  ;;  %v2576_v55 = vpop.f32.mrb[14].mxu0  ;;  %v3490_v10 = vld [vmem:[%s3581_s4] ss:$0 sm:$0xff] }
 0x219   : > { %v2529_v8 = vadd.f32 %v2528_v12, %v2527_v9  ;;  %v2530_v14 = vpop.f32.mrb[2].mxu1  ;;  %v2577_v15 = vpop.f32.mrb[15].mxu0 }
 0x21a   : > { %v2578_v16 = vadd.f32 %v2577_v15, %v2576_v55  ;;  %v2531_v17 = vpop.f32.mrb[3].mxu1 }
 0x21b   : > { %v900_v18 = vadd.f32 %v2569_v4, %v2529_v8  ;;  %v2532_v19 = vadd.f32 %v2531_v17, %v2530_v14 }
 0x21d   : > { %v903_v21 = vadd.f32 %v2572_v61, %v2532_v19 }
 0x21e   : > { %v2579_v22 = vpop.f32.mrb[16].mxu0 }
 0x21f   : > { %v2533_v24 = vpop.f32.mrb[4].mxu1  ;;  %v2580_v25 = vpop.f32.mrb[17].mxu0 }
 0x220   : > { %v2581_v26 = vadd.f32 %v2580_v25, %v2579_v22  ;;  %v2534_v27 = vpop.f32.mrb[5].mxu1  ;;  %v2582_v3 = vpop.f32.mrb[18].mxu0 }
 0x221   : > { %v2535_v28 = vadd.f32 %v2534_v27, %v2533_v24  ;;  %v2536_v29 = vpop.f32.mrb[6].mxu1  ;;  %v2583_v30 = vpop.f32.mrb[19].mxu0 }
 0x222   : > { %v2584_v32 = vadd.f32 %v2583_v30, %v2582_v3  ;;  %v2537_v34 = vpop.f32.mrb[7].mxu1 }
 0x223   : > { %v908_v13 = vadd.f32 %v2575_v11, %v2535_v28  ;;  %v2538_v23 = vadd.f32 %v2537_v34, %v2536_v29 }
 0x225   : > { %v3479_v31 = vadd.f32 %v2578_v16, %v2538_v23 }
 0x226   : > { %v2585_v35 = vpop.f32.mrb[20].mxu0 }
 0x227   : > { %v2539_v36 = vpop.f32.mrb[8].mxu1  ;;  %v2586_v37 = vpop.f32.mrb[21].mxu0 }
 0x228   : > { %v2587_v38 = vadd.f32 %v2586_v37, %v2585_v35  ;;  %v2540_v39 = vpop.f32.mrb[9].mxu1  ;;  %v2588_v33 = vpop.f32.mrb[22].mxu0 }
 0x229   : > { %v2541_v40 = vadd.f32 %v2540_v39, %v2539_v36  ;;  %v2542_v20 = vpop.f32.mrb[10].mxu1  ;;  %v2589_v41 = vpop.f32.mrb[23].mxu0 }
 0x22a   : > { %v2543_v42 = vpop.f32.mrb[11].mxu1 }
 0x22b   : > { %v3481_v43 = vadd.f32 %v2581_v26, %v2541_v40  ;;  %v2544_v44 = vadd.f32 %v2543_v42, %v2542_v20 }
 0x22d   : > { %v3483_v45 = vadd.f32 %v2584_v32, %v2544_v44 }
 0x22f   : > { %v2647_v46 = vpop.f32.mrb[24].mxu0  ;;  %v2545_v47 = vpop.f32.mrb[12].mxu1 }
 0x230   : > { %v2648_v48 = vpop.f32.mrb[25].mxu0  ;;  %v2546_v49 = vpop.f32.mrb[13].mxu1 }
 0x231   : > { %v2649_v50 = vadd.f32 %v2648_v48, %v2647_v46  ;;  %v2547_v51 = vadd.f32 %v2546_v49, %v2545_v47  ;;  %v2650_v52 = vpop.f32.mrb[26].mxu0  ;;  %v2548_v53 = vpop.f32.mrb[14].mxu1 }
 0x232   : > { %v2651_v54 = vpop.f32.mrb[27].mxu0  ;;  %v2549_v56 = vpop.f32.mrb[15].mxu1 }
 0x233   : > { %v3485_v57 = vadd.f32 %v2587_v38, %v2547_v51  ;;  %v2652_v58 = vadd.f32 %v2651_v54, %v2650_v52 }
 0x237   : > { %v2653_v59 = vpop.f32.mrb[28].mxu0  ;;  %v2607_v60 = vpop.f32.mrb[16].mxu1 }
 0x238   : > { %v2654_v62 = vpop.f32.mrb[29].mxu0  ;;  %v2608_v63 = vpop.f32.mrb[17].mxu1 }
 0x239   : > { %v2655_v0 = vadd.f32 %v2654_v62, %v2653_v59  ;;  %v2609_v1 = vadd.f32 %v2608_v63, %v2607_v60  ;;  %v2656_v2 = vpop.f32.mrb[30].mxu0  ;;  %v2610_v4 = vpop.f32.mrb[18].mxu1 }
 0x23a   : > { %v2657_v5 = vpop.f32.mrb[31].mxu0  ;;  %v2611_v6 = vpop.f32.mrb[19].mxu1 }
 0x23b   : > { %v1145_v61 = vadd.f32 %v2609_v1, %v900_v18  ;;  %v2658_v7 = vadd.f32 %v2657_v5, %v2656_v2  ;;  %v2612_v9 = vadd.f32 %v2611_v6, %v2610_v4 }
 0x23d   : > { %v1368_v11 = vadd.f32 %v2649_v50, %v1145_v61  ;;  %v1146_v12 = vadd.f32 %v2612_v9, %v903_v21 }
 0x23f   : > { %v1382_v55 = vadd.f32 %v3490_v10, %v1368_v11  ;;  %v1369_v8 = vadd.f32 %v2652_v58, %v1146_v12  ;;  %v2659_v14 = vpop.f32.mrb[32].mxu0  ;;  %v2613_v15 = vpop.f32.mrb[20].mxu1 }
 0x240   : > { %v2660_v16 = vpop.f32.mrb[33].mxu0  ;;  %v2614_v17 = vpop.f32.mrb[21].mxu1 }
 0x241   : > { %v1383_v19 = vadd.f32 %v3490_v10, %v1369_v8  ;;  %v2661_v22 = vadd.f32 %v2660_v16, %v2659_v14  ;;  %v2615_v18 = vadd.f32 %v2614_v17, %v2613_v15  ;;  %v2662_v24 = vpop.f32.mrb[34].mxu0  ;;  %v2616_v25 = vpop.f32.mrb[22].mxu1  ;;  %v1396_v26 = vrot.slane %v1382_v55, 1 }
 0x242   : > { %v2663_v27 = vpop.f32.mrb[35].mxu0  ;;  %v2617_v3 = vpop.f32.mrb[23].mxu1 }
 0x243   : > { %v1397_v28 = vrot.slane %v1383_v19, 1  ;;  %v1415_v29 = vpack.c.bf16 %v1383_v19, %v1382_v55  ;;  %v1147_v30 = vadd.f32 %v2615_v18, %v908_v13  ;;  %v2664_v21 = vadd.f32 %v2663_v27, %v2662_v24  ;;  %v2931_v27 = vld [vmem:[#allocation5 + $0x100] sm:$0xff]  }
 0x244   : > { %v2618_v32 = vadd.f32 %v2617_v3, %v2616_v25 }
 0x245   : > { %v1370_v34 = vadd.f32 %v2655_v0, %v1147_v30  ;;  %v1398_v23 = vsel %vm479_vm1, %v1396_v26, %v1397_v28  ;;  %v1497_v58 = vrot.slane %v1415_v29, 1  ;;  %v1856_v63 = vrot.slane %v1415_v29, 2 }
 0x246   : > { %v1148_v35 = vadd.f32 %v2618_v32, %v3479_v31 }
 0x247   : > { %v1384_v36 = vadd.f32 %v3490_v10, %v1370_v34  ;;  %v2665_v37 = vpop.f32.mrb[36].mxu0  ;;  %v2619_v38 = vpop.f32.mrb[24].mxu1 }
 0x248   : > { %v1371_v39 = vadd.f32 %v2658_v7, %v1148_v35  ;;  %v2666_v33 = vpop.f32.mrb[37].mxu0  ;;  %v2620_v40 = vpop.f32.mrb[25].mxu1 }
 0x249   : > { %v1399_v20 = vrot.slane %v1384_v36, 1  ;;  %v2667_v41 = vadd.f32 %v2666_v33, %v2665_v37  ;;  %v2621_v42 = vadd.f32 %v2620_v40, %v2619_v38  ;;  %v2668_v44 = vpop.f32.mrb[38].mxu0  ;;  %v2622_v46 = vpop.f32.mrb[26].mxu1  ;;  %v2934_v38 = vld [vmem:[#allocation5 + $0x150] sm:$0xff]  }
 0x24a   : > { %v1385_v13 = vadd.f32 %v3490_v10, %v1371_v39  ;;  %v2669_v47 = vpop.f32.mrb[39].mxu0  ;;  %v2623_v48 = vpop.f32.mrb[27].mxu1  ;;  %v2935_v44 = vld [vmem:[#allocation5 + $0x110] sm:$0xff]  }
 0x24b   : > { %v1149_v49 = vadd.f32 %v2621_v42, %v3481_v43  ;;  %v2624_v50 = vadd.f32 %v2623_v48, %v2622_v46  ;;  %v1400_v31 = vsel %vm479_vm1, %v1397_v28, %v1399_v20  ;;  %v2936_v47 = vld [vmem:[#allocation5 + $0x158] sm:$0xff]  }
 0x24c   : > { %v1401_v51 = vrot.slane %v1385_v13, 1  ;;  %v1416_v52 = vpack.c.bf16 %v1400_v31, %v1398_v23  ;;  %v1417_v53 = vpack.c.bf16 %v1385_v13, %v1384_v36  ;;  %v2933_v23 = vld [vmem:[#allocation5 + $0x108] sm:$0xff]   ;;  %v2938_v31 = vld [vmem:[#allocation5 + $0x160] sm:$0xff]  }
 0x24d   : > { %v1372_v54 = vadd.f32 %v2661_v22, %v1149_v49  ;;  %v1150_v56 = vadd.f32 %v2624_v50, %v3483_v45  ;;  %v2937_v50 = vld [vmem:[#allocation5 + $0x118] sm:$0xff]  }
 0x24e   : > { %1798 = vmatprep.mubr.bf16.mxu0 %v1416_v52  ;;  %v1402_v59 = vsel %vm479_vm1, %v1399_v20, %v1401_v51  ;;  %v1498_v60 = vrot.slane %v1417_v53, 1  ;;  %v1857_v62 = vrot.slane %v1417_v53, 2  ;;  %v1500_v22 = vrot.slane %v1416_v52, 1 }
 0x24f   : > { %v1386_v0 = vadd.f32 %v3490_v10, %v1372_v54  ;;  %v1373_v1 = vadd.f32 %v2664_v21, %v1150_v56  ;;  %v2625_v43 = vpop.f32.mrb[28].mxu1  ;;  %1799 = vmatmul.mubr.bf16.vlgmr.msra.gmra.mrb[40].mxu0 %v1415_v29  ;;  %v1859_v24 = vrot.slane %v1416_v52, 2  ;;  %v2932_v29 = vld [vmem:[#allocation5 + $0x148] sm:$0xff]   ;;  %v2942_v54 = vld [vmem:[#allocation5 + $0x170] sm:$0xff]  }
 0x250   : > { %v2626_v2 = vpop.f32.mrb[29].mxu1  ;;  %v1499_v4 = vsel %vm479_vm1, %v1497_v58, %v1498_v60  ;;  %v3505_v5 = vsel %vm962_vm3, %v1856_v63, %v1857_v62  ;;  %v2940_v52 = vld [vmem:[#allocation5 + $0x168] sm:$0xff]   ;;  %v2943_v56 = vld [vmem:[#allocation5 + $0x130] sm:$0xff]   ;;  %v2944_v58 = vld [vmem:[#allocation5 + $0x178] sm:$0xff]  }
 0x251   : > { %v1403_v6 = vrot.slane %v1386_v0, 1  ;;  %v1387_v45 = vadd.f32 %v3490_v10, %v1373_v1  ;;  %v2627_v61 = vadd.f32 %v2626_v2, %v2625_v43  ;;  %v2628_v7 = vpop.f32.mrb[30].mxu1 }
 0x252   : > { %v2629_v9 = vpop.f32.mrb[31].mxu1 }
 0x253   : > { %v1405_v11 = vrot.slane %v1387_v45, 1  ;;  %v1151_v12 = vadd.f32 %v2627_v61, %v3485_v57  ;;  %v1404_v55 = vsel %vm479_vm1, %v1401_v51, %v1403_v6  ;;  %v1419_v8 = vpack.c.bf16 %v1387_v45, %v1386_v0  ;;  %v2939_v51 = vld [vmem:[#allocation5 + $0x120] sm:$0xff]  }
 0x254   : > { %v1418_v14 = vpack.c.bf16 %v1404_v55, %v1402_v59  ;;  %v2945_v59 = vld [vmem:[#allocation5 + $0x138] sm:$0xff]  }
 0x255   : > { %v1374_v15 = vadd.f32 %v2667_v41, %v1151_v12  ;;  %v1406_v16 = vsel %vm479_vm1, %v1403_v6, %v1405_v11  ;;  %v1503_v17 = vrot.slane %v1419_v8, 1  ;;  %v1862_v19 = vrot.slane %v1419_v8, 2 }
 0x256   : > { %1806 = vmatprep.mubr.bf16.mxu0 %v1418_v14  ;;  %v1501_v18 = vrot.slane %v1418_v14, 1  ;;  %v1860_v25 = vrot.slane %v1418_v14, 2 }
 0x257   : > { %v1388_v26 = vadd.f32 %v3490_v10, %v1374_v15  ;;  %1807 = vmatmul.mubr.bf16.gmra.mrb[44].mxu0 %v1417_v53  ;;  %v1504_v57 = vsel %vm479_vm1, %v1498_v60, %v1503_v17  ;;  %v1863_v3 = vsel %vm962_vm3, %v1857_v62, %v1862_v19  ;;  %v2941_v53 = vld [vmem:[#allocation5 + $0x128] sm:$0xff]  }
 0x258   : > { %v1502_v28 = vsel %vm479_vm1, %v1500_v22, %v1501_v18  ;;  %v1861_v30 = vsel %vm962_vm3, %v1859_v24, %v1860_v25 }
 0x259   : > { %v1407_v21 = vrot.slane %v1388_v26, 1  ;;  %1645 = vmatprep.mubr.bf16.mxu1 %v1502_v28  ;;  %v1454_v32 = vpack.c.bf16 %v1388_v26, %v1388_v26 }
 0x25a   : > { %1646 = vmatmul.mubr.bf16.vlgmr.msra.gmra.mrb[32].mxu1 %v1499_v4 }
 0x25b   : > { %2740 = vmatpush3.bf16.msra.mxu1 %v2931_v27  ;;  %v1408_v34 = vsel %vm479_vm1, %v1405_v11, %v1407_v21  ;;  %v1455_v10 = vpack.c.bf16 %v1407_v21, %v1407_v21  ;;  %v1507_v35 = vrot.slane %v1454_v32, 1  ;;  %v1866_v36 = vrot.slane %v1454_v32, 2 }
 0x25c   : > { %2741 = vmatprep.subr.bf16.mxu1 %v2932_v29  ;;  %v1420_v37 = vpack.c.bf16 %v1408_v34, %v1406_v16 }
 0x25d   : > { %v1509_v39 = vrot.slane %v1455_v10, 1  ;;  %v1508_v33 = vsel %vm479_vm1, %v1503_v17, %v1507_v35  ;;  %v1868_v40 = vrot.slane %v1455_v10, 2  ;;  %v1867_v20 = vsel %vm962_vm3, %v1862_v19, %v1866_v36 }
 0x25e   : > { %1814 = vmatprep.mubr.bf16.mxu0 %v1420_v37  ;;  %v1505_v41 = vrot.slane %v1420_v37, 1  ;;  %v1864_v42 = vrot.slane %v1420_v37, 2 }
 0x25f   : > { %2742 = vmatpush3.bf16.msra.mxu1 %v2933_v23  ;;  %1815 = vmatmul.mubr.bf16.gmra.mrb[48].mxu0 %v1419_v8 }
 0x260   : > { %v1506_v46 = vsel %vm479_vm1, %v1501_v18, %v1505_v41  ;;  %2743 = vmatprep.subr.bf16.mxu1 %v2934_v38  ;;  %v1510_v13 = vsel %vm479_vm1, %v1505_v41, %v1509_v39  ;;  %v1865_v48 = vsel %vm962_vm3, %v1860_v25, %v1864_v42  ;;  %v1869_v49 = vsel %vm962_vm3, %v1864_v42, %v1868_v40  ;;  %v3529_v39 = vld [vmem:[%s3583_s6] ss:$0 sm:$0xff] }
 0x261   : > { %1653 = vmatprep.mubr.bf16.mxu1 %v1506_v46 }
 0x262   : > { %1654 = vmatmul.mubr.bf16.gmra.mrb[36].mxu1 %v1504_v57 }
 0x263   : > { %2744 = vmatpush3.bf16.msra.mxu1 %v2935_v44  ;;  %1661 = vmatprep.mubr.bf16.mxu1 %v1510_v13 }
 0x264   : > { %2745 = vmatprep.subr.bf16.mxu1 %v2936_v47 }
 0x267   : > { %2746 = vmatpush3.bf16.msra.mxu1 %v2937_v50 }
 0x268   : > { %2747 = vmatprep.subr.bf16.mxu1 %v2938_v31 }
 0x26a   : > { %1662 = vmatmul.mubr.bf16.gmra.mrb[40].mxu1 %v1508_v33 }
 0x26b   : > { %2748 = vmatpush3.bf16.msra.mxu1 %v2939_v51  ;;  %2004 = vmatprep.mubr.bf16.mxu1 %v1861_v30 }
 0x26c   : > { %2749 = vmatprep.subr.bf16.mxu1 %v2940_v52 }
 0x26f   : > { %2750 = vmatpush3.bf16.msra.mxu1 %v2941_v53 }
 0x270   : > { %2751 = vmatprep.subr.bf16.mxu1 %v2942_v54 }
 0x273   : > { %2752 = vmatpush3.bf16.msra.mxu1 %v2943_v56 }
 0x274   : > { %2753 = vmatprep.subr.bf16.mxu1 %v2944_v58 }
 0x277   : > { %2754 = vmatpush3.bf16.msra.mxu1 %v2945_v59 }
 0x27a   : > { %2005 = vmatmul.mubr.bf16.vlgmr.msra.gmra.mrb[44].mxu1 %v3505_v5 }
 0x27b   : > { %2012 = vmatprep.mubr.bf16.mxu1 %v1865_v48 }
 0x282   : > { %2013 = vmatmul.mubr.bf16.gmra.mrb[48].mxu1 %v1863_v3 }
 0x283   : > { %2020 = vmatprep.mubr.bf16.mxu1 %v1869_v49 }
 0x28a   : > { %2021 = vmatmul.mubr.bf16.gmra.mrb[52].mxu1 %v1867_v20 }
 0x322   : > { %v2721_v60 = vpop.f32.mrb[40].mxu0 }
 0x323   : > { %v2722_v62 = vpop.f32.mrb[41].mxu0 }
 0x324   : > { %v2723_v63 = vadd.f32 %v2722_v62, %v2721_v60  ;;  %v2724_v0 = vpop.f32.mrb[42].mxu0 }
 0x325   : > { %v2725_v1 = vpop.f32.mrb[43].mxu0 }
 0x326   : > { %v2726_v43 = vadd.f32 %v2725_v1, %v2724_v0 }
 0x32a   : > { %v2727_v2 = vpop.f32.mrb[44].mxu0 }
 0x32b   : > { %v2728_v4 = vpop.f32.mrb[45].mxu0 }
 0x32c   : > { %v2729_v6 = vadd.f32 %v2728_v4, %v2727_v2  ;;  %v2730_v45 = vpop.f32.mrb[46].mxu0 }
 0x32d   : > { %v2687_v61 = vpop.f32.mrb[32].mxu1  ;;  %v2731_v7 = vpop.f32.mrb[47].mxu0 }
 0x32e   : > { %v2732_v9 = vadd.f32 %v2731_v7, %v2730_v45  ;;  %v2688_v11 = vpop.f32.mrb[33].mxu1 }
 0x32f   : > { %v2689_v12 = vadd.f32 %v2688_v11, %v2687_v61  ;;  %v2690_v5 = vpop.f32.mrb[34].mxu1 }
 0x330   : > { %v2691_v55 = vpop.f32.mrb[35].mxu1 }
 0x331   : > { %v1801_v8 = vadd.f32 %v2723_v63, %v2689_v12  ;;  %v2692_v14 = vadd.f32 %v2691_v55, %v2690_v5 }
 0x332   : > { %v2733_v15 = vpop.f32.mrb[48].mxu0 }
 0x333   : > { %v1804_v16 = vadd.f32 %v2726_v43, %v2692_v14  ;;  %v2734_v17 = vpop.f32.mrb[49].mxu0 }
 0x334   : > { %v2735_v19 = vadd.f32 %v2734_v17, %v2733_v15  ;;  %v2736_v22 = vpop.f32.mrb[50].mxu0 }
 0x335   : > { %v2693_v18 = vpop.f32.mrb[36].mxu1  ;;  %v2737_v24 = vpop.f32.mrb[51].mxu0 }
 0x336   : > { %v2694_v25 = vpop.f32.mrb[37].mxu1 }
 0x337   : > { %v2695_v26 = vadd.f32 %v2694_v25, %v2693_v18  ;;  %v2696_v27 = vpop.f32.mrb[38].mxu1 }
 0x338   : > { %v2697_v57 = vpop.f32.mrb[39].mxu1 }
 0x339   : > { %v1809_v3 = vadd.f32 %v2729_v6, %v2695_v26  ;;  %v2698_v28 = vadd.f32 %v2697_v57, %v2696_v27 }
 0x33b   : > { %v1812_v29 = vadd.f32 %v2732_v9, %v2698_v28 }
 0x33d   : > { %v2699_v30 = vpop.f32.mrb[40].mxu1 }
 0x33e   : > { %v2700_v21 = vpop.f32.mrb[41].mxu1 }
 0x33f   : > { %v2701_v32 = vadd.f32 %v2700_v21, %v2699_v30  ;;  %v2702_v34 = vpop.f32.mrb[42].mxu1 }
 0x340   : > { %v2703_v23 = vpop.f32.mrb[43].mxu1 }
 0x341   : > { %v3524_v10 = vadd.f32 %v2735_v19, %v2701_v32 }
 0x34d   : > { %v2755_v35 = vpop.f32.mrb[44].mxu1 }
 0x34e   : > { %v2756_v36 = vpop.f32.mrb[45].mxu1 }
 0x34f   : > { %v2757_v37 = vadd.f32 %v2756_v36, %v2755_v35  ;;  %v2758_v38 = vpop.f32.mrb[46].mxu1 }
 0x350   : > { %v2759_v33 = vpop.f32.mrb[47].mxu1 }
 0x351   : > { %v2029_v40 = vadd.f32 %v2757_v37, %v1801_v8  ;;  %v2760_v20 = vadd.f32 %v2759_v33, %v2758_v38 }
 0x353   : > { %v2042_v41 = vadd.f32 %v3529_v39, %v2029_v40  ;;  %v2030_v42 = vadd.f32 %v2760_v20, %v1804_v16 }
 0x355   : > { %v2761_v44 = vpop.f32.mrb[48].mxu1  ;;  %v2054_v46 = vrot.slane %v2042_v41, 1  ;;  %v2043_v13 = vadd.f32 %v3529_v39, %v2030_v42  ;;  %v2076_v48 = vrot.slane %v2042_v41, 2  ;;  %v2098_v49 = vrot.slane %v2042_v41, 3 }
 0x356   : > { %v2762_v47 = vpop.f32.mrb[49].mxu1  ;;  %v2120_v50 = vrot.slane %v2042_v41, 4  ;;  %v2142_v59 = vrot.slane %v2042_v41, 5 }
 0x357   : > { %v2763_v31 = vadd.f32 %v2762_v47, %v2761_v44  ;;  %v2764_v51 = vpop.f32.mrb[50].mxu1  ;;  %v2055_v52 = vrot.slane %v2043_v13, 1  ;;  %v2077_v53 = vrot.slane %v2043_v13, 2  ;;  %v2099_v54 = vrot.slane %v2043_v13, 3 }
 0x358   : > { %v2121_v56 = vrot.slane %v2043_v13, 4  ;;  %v2765_v58 = vpop.f32.mrb[51].mxu1  ;;  %v2143_v60 = vrot.slane %v2043_v13, 5 }
 0x359   : > { %v2031_v62 = vadd.f32 %v2763_v31, %v1809_v3  ;;  %v2766_v63 = vadd.f32 %v2765_v58, %v2764_v51  ;;  %v2056_v0 = vsel %vm479_vm1, %v2054_v46, %v2055_v52  ;;  %v2078_v1 = vsel %vm962_vm3, %v2076_v48, %v2077_v53 }
 0x35a   : > { %v2100_v43 = vsel %vm1185_vm2, %v2098_v49, %v2099_v54  ;;  %v2122_v2 = vsel %vm2119_vm4, %v2120_v50, %v2121_v56  ;;  %v2070_v4 = vmax.f32 %v2042_v41, %v2056_v0  ;;  %v2144_v6 = vsel %vm2141_vm5, %v2142_v59, %v2143_v60 }
 0x35b   : > { %v2044_v45 = vadd.f32 %v3529_v39, %v2031_v62  ;;  %v2032_v61 = vadd.f32 %v2766_v63, %v1812_v29 }
 0x35c   : > { %v2092_v7 = vmax.f32 %v2070_v4, %v2078_v1 }
 0x35d   : > { %v2057_v9 = vrot.slane %v2044_v45, 1  ;;  %v2079_v11 = vrot.slane %v2044_v45, 2  ;;  %v2101_v12 = vrot.slane %v2044_v45, 3  ;;  %v2767_v5 = vpop.f32.mrb[52].mxu1  ;;  %v2123_v55 = vrot.slane %v2044_v45, 4 }
 0x35e   : > { %v2145_v8 = vrot.slane %v2044_v45, 5  ;;  %v2045_v14 = vadd.f32 %v3529_v39, %v2032_v61  ;;  %v2768_v15 = vpop.f32.mrb[53].mxu1  ;;  %v2114_v16 = vmax.f32 %v2092_v7, %v2100_v43 }
 0x35f   : > { %v2058_v17 = vsel %vm479_vm1, %v2055_v52, %v2057_v9  ;;  %v2080_v19 = vsel %vm962_vm3, %v2077_v53, %v2079_v11  ;;  %v2102_v22 = vsel %vm1185_vm2, %v2099_v54, %v2101_v12  ;;  %v2770_v18 = vpop.f32.mrb[54].mxu1  ;;  %v2124_v25 = vsel %vm2119_vm4, %v2121_v56, %v2123_v55 }
 0x360   : > { %v2071_v24 = vmax.f32 %v2043_v13, %v2058_v17  ;;  %v2146_v26 = vsel %vm2141_vm5, %v2143_v60, %v2145_v8  ;;  %v2059_v27 = vrot.slane %v2045_v14, 1  ;;  %v2771_v57 = vpop.f32.mrb[55].mxu1  ;;  %v2136_v3 = vmax.f32 %v2114_v16, %v2122_v2 }
 0x361   : > { %v2081_v28 = vrot.slane %v2045_v14, 2  ;;  %v2103_v29 = vrot.slane %v2045_v14, 3  ;;  %v2125_v30 = vrot.slane %v2045_v14, 4  ;;  %v2147_v34 = vrot.slane %v2045_v14, 5 }
 0x362   : > { %v2093_v21 = vmax.f32 %v2071_v24, %v2080_v19  ;;  %v2060_v32 = vsel %vm479_vm1, %v2057_v9, %v2059_v27  ;;  %v2769_v23 = vadd.f32 %v2768_v15, %v2767_v5  ;;  %v2158_v35 = vmax.f32 %v2136_v3, %v2144_v6 }
 0x363   : > { %v2072_v36 = vmax.f32 %v2044_v45, %v2060_v32  ;;  %v2082_v37 = vsel %vm962_vm3, %v2079_v11, %v2081_v28  ;;  %v2104_v38 = vsel %vm1185_vm2, %v2101_v12, %v2103_v29  ;;  %v2126_v40 = vsel %vm2119_vm4, %v2123_v55, %v2125_v30 }
 0x364   : > { %v2115_v33 = vmax.f32 %v2093_v21, %v2102_v22  ;;  %v2148_v20 = vsel %vm2141_vm5, %v2145_v8, %v2147_v34  ;;  %v2033_v41 = vadd.f32 %v2769_v23, %v3524_v10  ;;  %2164 = vst.msk [vmem:[#allocation2] sm:$0xff] %vm2163_vm6, %v2158_v35 }
 0x365   : > { %v2094_v42 = vmax.f32 %v2072_v36, %v2082_v37 }
 0x366   : > { %v2137_v44 = vmax.f32 %v2115_v33, %v2124_v25  ;;  %v2046_v46 = vadd.f32 %v3529_v39, %v2033_v41 }
 0x367   : > { %v2116_v13 = vmax.f32 %v2094_v42, %v2104_v38 }
 0x368   : > { %v2159_v47 = vmax.f32 %v2137_v44, %v2146_v26  ;;  %v2061_v48 = vrot.slane %v2046_v46, 1  ;;  %v2083_v49 = vrot.slane %v2046_v46, 2  ;;  %v2105_v50 = vrot.slane %v2046_v46, 3 }
 0x369   : > { %v2138_v31 = vmax.f32 %v2116_v13, %v2126_v40  ;;  %v2127_v51 = vrot.slane %v2046_v46, 4  ;;  %v2149_v52 = vrot.slane %v2046_v46, 5 }
 0x36a   : > { %2165 = vst.msk [vmem:[#allocation2 + $0x8] sm:$0xff] %vm2163_vm6, %v2159_v47  ;;  %v2062_v10 = vsel %vm479_vm1, %v2059_v27, %v2061_v48  ;;  %v2084_v39 = vsel %vm962_vm3, %v2081_v28, %v2083_v49  ;;  %v2106_v53 = vsel %vm1185_vm2, %v2103_v29, %v2105_v50 }
 0x36b   : > { %v2160_v54 = vmax.f32 %v2138_v31, %v2148_v20  ;;  %v2073_v56 = vmax.f32 %v2045_v14, %v2062_v10  ;;  %v2128_v58 = vsel %vm2119_vm4, %v2125_v30, %v2127_v51  ;;  %v2150_v59 = vsel %vm2141_vm5, %v2147_v34, %v2149_v52  ;;  %v2169_v60 = vld [vmem:[#allocation2] ss:$64 sm:$0x1]  ;;  %v2173_v62 = vld [vmem:[#allocation2 + $0x6] ss:$64 sm:$0x1] }
 0x36c   : > { %2171 = vst.msk [vmem:[%s308_s9] sm:$0x1] %vm2170_vm7, %v2169_v60  ;;  %2174 = vst.msk [vmem:[%s308_s9 + $0x1] sm:$0x1] %vm2170_vm7, %v2173_v62 }
 0x36d   : > { %2166 = vst.msk [vmem:[#allocation2 + $0x10] sm:$0xff] %vm2163_vm6, %v2160_v54  ;;  %v2095_v63 = vmax.f32 %v2073_v56, %v2084_v39 }
 0x36f   : > { %v2117_v0 = vmax.f32 %v2095_v63, %v2106_v53 }
 0x371   : > { %v2176_v1 = vld [vmem:[#allocation2 + $0xc] ss:$64 sm:$0x1]  ;;  %v2139_v43 = vmax.f32 %v2117_v0, %v2128_v58 }
 0x372   : > { %2177 = vst.msk [vmem:[%s308_s9 + $0x2] sm:$0x1] %vm2170_vm7, %v2176_v1 }
 0x373   : > { %v2161_v2 = vmax.f32 %v2139_v43, %v2150_v59 }
 0x374   : > { %v2179_v4 = vld [vmem:[#allocation2 + $0x12] ss:$64 sm:$0x1] }
 0x375   : > { %2180 = vst.msk [vmem:[%s308_s9 + $0x3] sm:$0x1] %vm2170_vm7, %v2179_v4 }
 0x376   : > { %2167 = vst.msk [vmem:[#allocation2 + $0x18] sm:$0xff] %vm2163_vm6, %v2161_v2 }
 0x37d   : > { %v2182_v6 = vld [vmem:[#allocation2 + $0x18] ss:$64 sm:$0x1]  ;;  %v2185_v45 = vld [vmem:[#allocation2 + $0x1e] ss:$64 sm:$0x1] }
 0x37e   : > { %2183 = vst.msk [vmem:[%s308_s9 + $0x4] sm:$0x1] %vm2170_vm7, %v2182_v6  ;;  %2186 = vst.msk [vmem:[%s308_s9 + $0x5] sm:$0x1] %vm2170_vm7, %v2185_v45 }
 0x37f PF: > { %s19_s24 = sadd.s32 1, %s3016_s24  }
 0x380   : > { %p16_p10 = scmp.ge.s32.totalorder %s19_s24, 4  }
 0x382   :  { %18 = sbr.rel (!%p16_p10) target bundleno = 2 (0x2), region = 97 }
 0x389   :  { %2206 = vsyncpa [#allocation4], 1 }
 0x38a   :  { %2208 = vsyncpa [#allocation4 + $0x1], 1 }
 0x38b   :  { %2209 = vsyncpa [#allocation6], 1 }

</bundles_post_ra>
